<compile_context>
chip_gen: v6e
topology: v6e:2x2x1
jax: 0.10.0
libtpu: 0.0.40
codegen_flags: <defaults>
</compile_context>

<pallas_src>
import math

import jax
import jax.numpy as jnp
from jax import lax
from jax.experimental import pallas as pl
from jax.experimental.pallas import tpu as pltpu

LEAKY_SLOPE = 0.01       # torch.nn.LeakyReLU default
BN_EPS = 1e-5            # torch.nn.BatchNorm1d default
NEG_INF = -1e30


def _leaky(x):
    return jnp.where(x >= 0, x, LEAKY_SLOPE * x)


def _masked_softmax_attn(q, k, v, adj, scale):
    # q,k,v: [N, D]; adj: [N, N] with adj[i, j] = 1 iff edge j -> i.
    s = lax.dot_general(q, k, (((1,), (1,)), ((), ())),
                        preferred_element_type=jnp.float32) * scale
    s = jnp.where(adj > 0.0, s, NEG_INF)
    m = jnp.max(s, axis=1, keepdims=True)
    e = jnp.exp(s - m) * adj
    den = jnp.sum(e, axis=1, keepdims=True)
    # rows with no in-edges: e == 0 everywhere -> output row is all zeros.
    p = e * pl.reciprocal(jnp.maximum(den, 1e-30), approx=True)
    return jnp.dot(p, v, preferred_element_type=jnp.float32)


# ---------------------------------------------------------------------------
# Single fused kernel: LSTM -> TransformerBlock -> TransformerConv -> head
# ---------------------------------------------------------------------------
def _policy_kernel(agent_ref,                                   # SMEM [1] int32
                   x_ref, edge_ref, sub_ref, eig_ref, amask_ref,
                   wih_ref, whh_ref, lb_ref,
                   w0x_ref, w0p_ref, b0_ref, p0w_ref, p0b_ref, g0_ref, be0_ref,
                   w1x_ref, w1v_ref, w1p_ref, b1_ref,
                   h1w_ref, h1b_ref, h2w_ref, h2b_ref,
                   out_ref):
    nn = sub_ref.shape[0]                 # number of (sub)graph nodes
    tn = x_ref.shape[0]                   # T * N (time-flattened LSTM input)
    T = tn // nn
    H = whh_ref.shape[0]                  # hidden features
    h4 = w0x_ref.shape[1] // 4            # heads0 * H (layer-0 per-proj width)
    heads0 = h4 // H
    scale = 1.0 / math.sqrt(H)

    # ---- LSTM (input projection hoisted out of the recurrence, T unrolled) ----
    xw = (jnp.dot(x_ref[...], wih_ref[...], preferred_element_type=jnp.float32)
          + lb_ref[...])                                        # [T*N, 4H]
    whh = whh_ref[...]
    h = jnp.zeros((nn, H), jnp.float32)
    c = jnp.zeros((nn, H), jnp.float32)
    for t in range(T):                                          # static unroll
        gates = xw[t * nn:(t + 1) * nn, :] + jnp.dot(
            h, whh, preferred_element_type=jnp.float32)         # [N, 4H]
        i_g = jax.nn.sigmoid(gates[:, 0 * H:1 * H])
        f_g = jax.nn.sigmoid(gates[:, 1 * H:2 * H])
        g_g = jnp.tanh(gates[:, 2 * H:3 * H])
        o_g = jax.nn.sigmoid(gates[:, 3 * H:4 * H])
        c = f_g * c + i_g * g_g
        h = o_g * jnp.tanh(c)
    x0 = h                                                      # [N, H]

    # ---- adjacency mask from edge_index (one-hot matmul, no scatter) ----
    E = edge_ref.shape[1]
    src = edge_ref[0:1, :]                                      # [1, E]
    dst = edge_ref[1:2, :]                                      # [1, E]
    row_ids = lax.broadcasted_iota(jnp.int32, (nn, E), 0)
    onehot_dst = (row_ids == dst).astype(jnp.float32)           # [N, E]
    onehot_src = (row_ids == src).astype(jnp.float32)           # [N, E]
    adj = (lax.dot_general(onehot_dst, onehot_src, (((1,), (1,)), ((), ())),
                           preferred_element_type=jnp.float32) > 0.0
           ).astype(jnp.float32)                                # adj[i,j]=1 iff j->i

    # ---- positional encoding gather: pos = eigenvecs[subgraph_indices] ----
    M = eig_ref.shape[0]
    sub = sub_ref[...]                                          # [N, 1] int32
    col_ids = lax.broadcasted_iota(jnp.int32, (nn, M), 1)
    sel = (col_ids == sub).astype(jnp.float32)                  # [N, M]
    pos = jnp.dot(sel, eig_ref[...], preferred_element_type=jnp.float32)

    # ---- layer 0: TransformerConv(heads=4) + proj + BN(train) + LeakyReLU ----
    # fused [Q|K|V|skip] projection, input concat replaced by split contraction
    qkvs0 = (jnp.dot(x0, w0x_ref[...], preferred_element_type=jnp.float32)
             + jnp.dot(pos, w0p_ref[...], preferred_element_type=jnp.float32)
             + b0_ref[...])                                     # [N, 4*h4]
    p0w = p0w_ref[...]                                          # [h4, H]
    # (concat_heads + skip) @ Wproj, accumulated per head (no concat / scratch)
    acc = p0b_ref[...] + jnp.dot(qkvs0[:, 3 * h4:4 * h4], p0w,
                                 preferred_element_type=jnp.float32)
    for hh in range(heads0):
        lo = hh * H
        qh = qkvs0[:, 0 * h4 + lo:0 * h4 + lo + H]
        kh = qkvs0[:, 1 * h4 + lo:1 * h4 + lo + H]
        vh = qkvs0[:, 2 * h4 + lo:2 * h4 + lo + H]
        oh = _masked_softmax_attn(qh, kh, vh, adj, scale)       # [N, H]
        acc = acc + jnp.dot(oh, p0w[lo:lo + H, :],
                            preferred_element_type=jnp.float32)
    # BatchNorm1d (training mode: batch stats, biased variance) + LeakyReLU
    mean = jnp.mean(acc, axis=0, keepdims=True)
    var = jnp.mean((acc - mean) ** 2, axis=0, keepdims=True)
    x1 = _leaky((acc - mean) * lax.rsqrt(var + BN_EPS) * g0_ref[...] + be0_ref[...])

    # ---- layer 1 (final): TransformerConv(heads=1), raw output ----
    qkvs1 = (jnp.dot(x1, w1x_ref[...], preferred_element_type=jnp.float32)
             + jnp.dot(x0, w1v_ref[...], preferred_element_type=jnp.float32)
             + jnp.dot(pos, w1p_ref[...], preferred_element_type=jnp.float32)
             + b1_ref[...])                                     # [N, 4H]
    x2 = (_masked_softmax_attn(qkvs1[:, 0:H], qkvs1[:, H:2 * H],
                               qkvs1[:, 2 * H:3 * H], adj, scale)
          + qkvs1[:, 3 * H:4 * H])                              # [N, H]

    # ---- projection head on the agent's node + action mask ----
    agent_idx = agent_ref[0]
    agent_sel = (sub == agent_idx).astype(jnp.float32)          # [N, 1]
    xa = jnp.sum(agent_sel * x2, axis=0, keepdims=True)         # [1, H]
    y = _leaky(jnp.dot(xa, h1w_ref[...], preferred_element_type=jnp.float32)
               + h1b_ref[...])
    logits = (jnp.dot(y, h2w_ref[...], preferred_element_type=jnp.float32)
              + h2b_ref[...])                                   # [1, OUT]
    nm = amask_ref.shape[0]
    mrow_sel = (lax.broadcasted_iota(jnp.int32, (1, nm), 1)
                == agent_idx).astype(jnp.float32)               # [1, NM]
    mask_row = jnp.dot(mrow_sel, amask_ref[...],
                       preferred_element_type=jnp.float32)      # [1, OUT]
    out_ref[...] = logits + (1.0 - mask_row) * -1e9


# ---------------------------------------------------------------------------
# Wrapper: single pallas_call, everything VMEM-resident (agent index in SMEM)
# ---------------------------------------------------------------------------
def policy_network_forward(packed, node_features, edge_index, agent_index,
                           subgraph_indices, eigenvecs, action_mask):
    T, N, F = node_features.shape
    OUT = packed["h2w"].shape[1]
    vmem = pl.BlockSpec(memory_space=pltpu.MemorySpace.VMEM)
    smem = pl.BlockSpec(memory_space=pltpu.MemorySpace.SMEM)

    x_flat = node_features.reshape(T * N, F)                     # free reshape
    sub_col = subgraph_indices.astype(jnp.int32).reshape(N, 1)
    agent = jnp.reshape(agent_index, (1,)).astype(jnp.int32)
    edges = edge_index.astype(jnp.int32)

    logits = pl.pallas_call(
        _policy_kernel,
        out_shape=jax.ShapeDtypeStruct((1, OUT), jnp.float32),
        in_specs=[smem] + [vmem] * 23,
        out_specs=vmem,
    )(agent, x_flat, edges, sub_col, eigenvecs, action_mask,
      packed["lstm_w_ih"], packed["lstm_w_hh"], packed["lstm_b"],
      packed["l0_w_x"], packed["l0_w_pos"], packed["l0_b"],
      packed["l0_proj_w"], packed["l0_proj_b"], packed["l0_gamma"], packed["l0_beta"],
      packed["l1_w_x"], packed["l1_w_prev"], packed["l1_w_pos"], packed["l1_b"],
      packed["h1w"], packed["h1b"], packed["h2w"], packed["h2b"])
    return logits[0]


# ---------------------------------------------------------------------------
# Deterministic parameter init (torch layout) + one-time packing
# ---------------------------------------------------------------------------
def init_params(key, in_features, hidden, eigen_len, out_features):
    ks = iter(jax.random.split(key, 64))

    def rnd(shape, scale=0.1):
        return scale * jax.random.normal(next(ks), shape, dtype=jnp.float32)

    p = {}
    p["lstm_w_ih"] = rnd((4 * hidden, in_features))
    p["lstm_w_hh"] = rnd((4 * hidden, hidden))
    p["lstm_b"] = rnd((4 * hidden,))            # b_ih + b_hh folded together

    in0 = hidden + eigen_len                    # first TransformerBlock input dim
    h4 = 4 * hidden
    p["layer0"] = dict(
        wq=rnd((h4, in0)), bq=rnd((h4,)),
        wk=rnd((h4, in0)), bk=rnd((h4,)),
        wv=rnd((h4, in0)), bv=rnd((h4,)),
        wskip=rnd((h4, in0)), bskip=rnd((h4,)),
        proj_w=rnd((hidden, h4)), proj_b=rnd((hidden,)),
        gamma=1.0 + rnd((hidden,)), beta=rnd((hidden,)),
    )

    in1 = hidden + hidden + eigen_len           # final TransformerConv input dim
    p["layer1"] = dict(
        wq=rnd((hidden, in1)), bq=rnd((hidden,)),
        wk=rnd((hidden, in1)), bk=rnd((hidden,)),
        wv=rnd((hidden, in1)), bv=rnd((hidden,)),
        wskip=rnd((hidden, in1)), bskip=rnd((hidden,)),
    )

    p["head_w1"] = rnd((hidden, hidden))
    p["head_b1"] = rnd((hidden,))
    p["head_w2"] = rnd((out_features, hidden))
    p["head_b2"] = rnd((out_features,))
    return p


def pack_params(p):
    """One-time packing: transpose to [in,out], fuse [Q|K|V|skip] along the
    output dim, and split the fused weights along the input pieces (x / prev /
    pos) so no concat is needed at forward time."""
    hidden = p["lstm_w_hh"].shape[1]

    def fuse(layer):
        w = jnp.concatenate([layer["wq"].T, layer["wk"].T,
                             layer["wv"].T, layer["wskip"].T], axis=1)
        b = jnp.concatenate([layer["bq"], layer["bk"],
                             layer["bv"], layer["bskip"]]).reshape(1, -1)
        return w, b

    w0, b0 = fuse(p["layer0"])      # [hidden+eig, 4*h4]
    w1, b1 = fuse(p["layer1"])      # [2*hidden+eig, 4*hidden]
    packed = {
        "lstm_w_ih": p["lstm_w_ih"].T,
        "lstm_w_hh": p["lstm_w_hh"].T,
        "lstm_b": p["lstm_b"].reshape(1, -1),
        "l0_w_x": w0[:hidden],
        "l0_w_pos": w0[hidden:],
        "l0_b": b0,
        "l0_proj_w": p["layer0"]["proj_w"].T,
        "l0_proj_b": p["layer0"]["proj_b"].reshape(1, -1),
        "l0_gamma": p["layer0"]["gamma"].reshape(1, -1),
        "l0_beta": p["layer0"]["beta"].reshape(1, -1),
        "l1_w_x": w1[:hidden],
        "l1_w_prev": w1[hidden:2 * hidden],
        "l1_w_pos": w1[2 * hidden:],
        "l1_b": b1,
        "h1w": p["head_w1"].T,
        "h1b": p["head_b1"].reshape(1, -1),
        "h2w": p["head_w2"].T,
        "h2b": p["head_b2"].reshape(1, -1),
    }
    return jax.tree.map(lambda a: jnp.asarray(a, jnp.float32), packed)


# ---------------------------------------------------------------------------
# Pure-JAX reference (torch-layout params) for a correctness cross-check
# ---------------------------------------------------------------------------
def reference_forward(p, node_features, edge_index, agent_index,
                      subgraph_indices, eigenvecs, action_mask):
    T, N, F = node_features.shape
    H = p["lstm_w_hh"].shape[1]

    w_ih, w_hh, b = p["lstm_w_ih"], p["lstm_w_hh"], p["lstm_b"]
    h = jnp.zeros((N, H), jnp.float32)
    c = jnp.zeros((N, H), jnp.float32)
    for t in range(T):
        gates = node_features[t] @ w_ih.T + h @ w_hh.T + b
        i = jax.nn.sigmoid(gates[:, :H])
        f = jax.nn.sigmoid(gates[:, H:2 * H])
        g = jnp.tanh(gates[:, 2 * H:3 * H])
        o = jax.nn.sigmoid(gates[:, 3 * H:4 * H])
        c = f * c + i * g
        h = o * jnp.tanh(c)
    x0 = h

    pos = eigenvecs[subgraph_indices]
    src, dst = edge_index[0], edge_index[1]
    adj = jnp.zeros((N, N), jnp.float32).at[dst, src].set(1.0)  # adj[i,j]: j->i

    def transformer_conv(layer, xin, heads):
        q = xin @ layer["wq"].T + layer["bq"]
        k = xin @ layer["wk"].T + layer["bk"]
        v = xin @ layer["wv"].T + layer["bv"]
        skip = xin @ layer["wskip"].T + layer["bskip"]
        outs = []
        scale = 1.0 / math.sqrt(H)
        for hh in range(heads):
            qh = q[:, hh * H:(hh + 1) * H]
            kh = k[:, hh * H:(hh + 1) * H]
            vh = v[:, hh * H:(hh + 1) * H]
            s = jnp.where(adj > 0, qh @ kh.T * scale, NEG_INF)
            a = jax.nn.softmax(s, axis=1) * adj
            outs.append(a @ vh)
        return jnp.concatenate(outs, axis=1) + skip

    t0 = transformer_conv(p["layer0"], jnp.concatenate([x0, pos], axis=1), 4)
    proj = t0 @ p["layer0"]["proj_w"].T + p["layer0"]["proj_b"]
    mean = proj.mean(axis=0)
    var = ((proj - mean) ** 2).mean(axis=0)
    bn = (proj - mean) / jnp.sqrt(var + BN_EPS) * p["layer0"]["gamma"] \
        + p["layer0"]["beta"]
    x1 = jnp.where(bn >= 0, bn, LEAKY_SLOPE * bn)

    x2 = transformer_conv(p["layer1"],
                          jnp.concatenate([x1, x0, pos], axis=1), 1)

    idx = jnp.argmax((subgraph_indices == agent_index).astype(jnp.int32))
    xa = x2[idx]
    y = xa @ p["head_w1"].T + p["head_b1"]
    y = jnp.where(y >= 0, y, LEAKY_SLOPE * y)
    logits = y @ p["head_w2"].T + p["head_b2"]
    return logits + (1.0 - action_mask[agent_index]) * -1e9


if __name__ == "__main__":
    key = jax.random.PRNGKey(0)
    k_feat, k_eig, k_mask, k_param = jax.random.split(key, 4)

    T, N, F = 4, 8, 8          # timesteps, nodes (= subgraph size), in_features
    HIDDEN = 32
    OUT = 4                    # output_features (number of actions)
    EIG = N                    # eigenvecs is [N, N] (square Laplacian eigenbasis)

    node_features = jax.random.normal(k_feat, (T, N, F), dtype=jnp.float32)
    eigenvecs = jax.random.normal(k_eig, (N, EIG), dtype=jnp.float32)
    subgraph_indices = jnp.arange(N, dtype=jnp.int32)
    agent_index = jnp.int32(3)

    # ring graph, both directions: edge_index[0]=source, edge_index[1]=target
    i = jnp.arange(N, dtype=jnp.int32)
    src = jnp.concatenate([i, (i + 1) % N])
    dst = jnp.concatenate([(i + 1) % N, i])
    edge_index = jnp.stack([src, dst])

    action_mask = (jax.random.uniform(k_mask, (N, OUT)) > 0.3).astype(jnp.float32)

    raw_params = init_params(k_param, F, HIDDEN, EIG, OUT)
    params = pack_params(raw_params)

    fwd = jax.jit(policy_network_forward)
    logits = fwd(params, node_features, edge_index, agent_index,
                 subgraph_indices, eigenvecs, action_mask)
    jax.block_until_ready(logits)
    assert logits.shape == (OUT,)

    ref = reference_forward(raw_params, node_features, edge_index, agent_index,
                            subgraph_indices, eigenvecs, action_mask)
    assert bool(jnp.all(jnp.isfinite(logits))), "non-finite logits"
    assert bool(jnp.allclose(logits, ref, rtol=1e-2, atol=1e-2)), \
        f"mismatch vs reference: {logits} vs {ref}"
    print("KERNEL_OK")
</pallas_src>

<mosaic_0001>
module attributes {stable_mosaic.version = 11 : i64} {
  func.func @_policy_kernel(%arg0: memref<1xi32, #tpu.memory_space<smem>>, %arg1: memref<32x8xf32, #tpu.memory_space<vmem>>, %arg2: memref<2x16xi32, #tpu.memory_space<vmem>>, %arg3: memref<8x1xi32, #tpu.memory_space<vmem>>, %arg4: memref<8x8xf32, #tpu.memory_space<vmem>>, %arg5: memref<8x4xf32, #tpu.memory_space<vmem>>, %arg6: memref<8x128xf32, #tpu.memory_space<vmem>>, %arg7: memref<32x128xf32, #tpu.memory_space<vmem>>, %arg8: memref<1x128xf32, #tpu.memory_space<vmem>>, %arg9: memref<32x512xf32, #tpu.memory_space<vmem>>, %arg10: memref<8x512xf32, #tpu.memory_space<vmem>>, %arg11: memref<1x512xf32, #tpu.memory_space<vmem>>, %arg12: memref<128x32xf32, #tpu.memory_space<vmem>>, %arg13: memref<1x32xf32, #tpu.memory_space<vmem>>, %arg14: memref<1x32xf32, #tpu.memory_space<vmem>>, %arg15: memref<1x32xf32, #tpu.memory_space<vmem>>, %arg16: memref<32x128xf32, #tpu.memory_space<vmem>>, %arg17: memref<32x128xf32, #tpu.memory_space<vmem>>, %arg18: memref<8x128xf32, #tpu.memory_space<vmem>>, %arg19: memref<1x128xf32, #tpu.memory_space<vmem>>, %arg20: memref<32x32xf32, #tpu.memory_space<vmem>>, %arg21: memref<1x32xf32, #tpu.memory_space<vmem>>, %arg22: memref<32x4xf32, #tpu.memory_space<vmem>>, %arg23: memref<1x4xf32, #tpu.memory_space<vmem>>, %arg24: memref<1x4xf32, #tpu.memory_space<vmem>>) attributes {dimension_semantics = [], scalar_prefetch = 0 : i64, scratch_operands = 0 : i64, tpu.core_type = #tpu.core_type<tc>} {
    %c0 = arith.constant 0 : index
    %c0_0 = arith.constant 0 : index
    %0 = vector.load %arg1[%c0, %c0_0] : memref<32x8xf32, #tpu.memory_space<vmem>>, vector<32x8xf32>
    %c0_1 = arith.constant 0 : index
    %c0_2 = arith.constant 0 : index
    %1 = vector.load %arg6[%c0_1, %c0_2] : memref<8x128xf32, #tpu.memory_space<vmem>>, vector<8x128xf32>
    %cst = arith.constant dense<0.000000e+00> : vector<32x128xf32>
    %2 = tpu.matmul %0, %1, %cst {dimension_numbers = #tpu.dot_dimension_numbers<[1], [0], [0], [1], [0, 0, 1, 1], [], []>} : vector<32x8xf32>, vector<8x128xf32>, vector<32x128xf32> -> vector<32x128xf32>
    %c0_3 = arith.constant 0 : index
    %c0_4 = arith.constant 0 : index
    %3 = vector.load %arg8[%c0_3, %c0_4] : memref<1x128xf32, #tpu.memory_space<vmem>>, vector<1x128xf32>
    %4 = vector.broadcast %3 : vector<1x128xf32> to vector<32x128xf32>
    %5 = arith.addf %2, %4 : vector<32x128xf32>
    %c0_5 = arith.constant 0 : index
    %c0_6 = arith.constant 0 : index
    %6 = vector.load %arg7[%c0_5, %c0_6] : memref<32x128xf32, #tpu.memory_space<vmem>>, vector<32x128xf32>
    %cst_7 = arith.constant 0.000000e+00 : f32
    %7 = vector.broadcast %cst_7 : f32 to vector<8x32xf32>
    %cst_8 = arith.constant 0.000000e+00 : f32
    %8 = vector.broadcast %cst_8 : f32 to vector<8x32xf32>
    %9 = vector.extract_strided_slice %5 {offsets = [0, 0], sizes = [8, 128], strides = [1, 1]} : vector<32x128xf32> to vector<8x128xf32>
    %cst_9 = arith.constant dense<0.000000e+00> : vector<8x128xf32>
    %10 = tpu.matmul %7, %6, %cst_9 {dimension_numbers = #tpu.dot_dimension_numbers<[1], [0], [0], [1], [0, 0, 1, 1], [], []>} : vector<8x32xf32>, vector<32x128xf32>, vector<8x128xf32> -> vector<8x128xf32>
    %11 = arith.addf %9, %10 : vector<8x128xf32>
    %12 = vector.extract_strided_slice %11 {offsets = [0, 0], sizes = [8, 32], strides = [1, 1]} : vector<8x128xf32> to vector<8x32xf32>
    %13 = arith.negf %12 : vector<8x32xf32>
    %14 = math.exp %13 : vector<8x32xf32>
    %cst_10 = arith.constant 1.000000e+00 : f32
    %15 = vector.broadcast %cst_10 : f32 to vector<8x32xf32>
    %16 = arith.addf %15, %14 : vector<8x32xf32>
    %17 = arith.divf %15, %16 : vector<8x32xf32>
    %18 = vector.extract_strided_slice %11 {offsets = [0, 32], sizes = [8, 32], strides = [1, 1]} : vector<8x128xf32> to vector<8x32xf32>
    %19 = arith.negf %18 : vector<8x32xf32>
    %20 = math.exp %19 : vector<8x32xf32>
    %cst_11 = arith.constant 1.000000e+00 : f32
    %21 = vector.broadcast %cst_11 : f32 to vector<8x32xf32>
    %22 = arith.addf %21, %20 : vector<8x32xf32>
    %23 = arith.divf %21, %22 : vector<8x32xf32>
    %24 = vector.extract_strided_slice %11 {offsets = [0, 64], sizes = [8, 32], strides = [1, 1]} : vector<8x128xf32> to vector<8x32xf32>
    %25 = math.tanh %24 : vector<8x32xf32>
    %26 = vector.extract_strided_slice %11 {offsets = [0, 96], sizes = [8, 32], strides = [1, 1]} : vector<8x128xf32> to vector<8x32xf32>
    %27 = arith.negf %26 : vector<8x32xf32>
    %28 = math.exp %27 : vector<8x32xf32>
    %cst_12 = arith.constant 1.000000e+00 : f32
    %29 = vector.broadcast %cst_12 : f32 to vector<8x32xf32>
    %30 = arith.addf %29, %28 : vector<8x32xf32>
    %31 = arith.divf %29, %30 : vector<8x32xf32>
    %32 = arith.mulf %23, %8 : vector<8x32xf32>
    %33 = arith.mulf %17, %25 : vector<8x32xf32>
    %34 = arith.addf %32, %33 : vector<8x32xf32>
    %35 = math.tanh %34 : vector<8x32xf32>
    %36 = arith.mulf %31, %35 : vector<8x32xf32>
    %37 = vector.extract_strided_slice %5 {offsets = [8, 0], sizes = [8, 128], strides = [1, 1]} : vector<32x128xf32> to vector<8x128xf32>
    %cst_13 = arith.constant dense<0.000000e+00> : vector<8x128xf32>
    %38 = tpu.matmul %36, %6, %cst_13 {dimension_numbers = #tpu.dot_dimension_numbers<[1], [0], [0], [1], [0, 0, 1, 1], [], []>} : vector<8x32xf32>, vector<32x128xf32>, vector<8x128xf32> -> vector<8x128xf32>
    %39 = arith.addf %37, %38 : vector<8x128xf32>
    %40 = vector.extract_strided_slice %39 {offsets = [0, 0], sizes = [8, 32], strides = [1, 1]} : vector<8x128xf32> to vector<8x32xf32>
    %41 = arith.negf %40 : vector<8x32xf32>
    %42 = math.exp %41 : vector<8x32xf32>
    %cst_14 = arith.constant 1.000000e+00 : f32
    %43 = vector.broadcast %cst_14 : f32 to vector<8x32xf32>
    %44 = arith.addf %43, %42 : vector<8x32xf32>
    %45 = arith.divf %43, %44 : vector<8x32xf32>
    %46 = vector.extract_strided_slice %39 {offsets = [0, 32], sizes = [8, 32], strides = [1, 1]} : vector<8x128xf32> to vector<8x32xf32>
    %47 = arith.negf %46 : vector<8x32xf32>
    %48 = math.exp %47 : vector<8x32xf32>
    %cst_15 = arith.constant 1.000000e+00 : f32
    %49 = vector.broadcast %cst_15 : f32 to vector<8x32xf32>
    %50 = arith.addf %49, %48 : vector<8x32xf32>
    %51 = arith.divf %49, %50 : vector<8x32xf32>
    %52 = vector.extract_strided_slice %39 {offsets = [0, 64], sizes = [8, 32], strides = [1, 1]} : vector<8x128xf32> to vector<8x32xf32>
    %53 = math.tanh %52 : vector<8x32xf32>
    %54 = vector.extract_strided_slice %39 {offsets = [0, 96], sizes = [8, 32], strides = [1, 1]} : vector<8x128xf32> to vector<8x32xf32>
    %55 = arith.negf %54 : vector<8x32xf32>
    %56 = math.exp %55 : vector<8x32xf32>
    %cst_16 = arith.constant 1.000000e+00 : f32
    %57 = vector.broadcast %cst_16 : f32 to vector<8x32xf32>
    %58 = arith.addf %57, %56 : vector<8x32xf32>
    %59 = arith.divf %57, %58 : vector<8x32xf32>
    %60 = arith.mulf %51, %34 : vector<8x32xf32>
    %61 = arith.mulf %45, %53 : vector<8x32xf32>
    %62 = arith.addf %60, %61 : vector<8x32xf32>
    %63 = math.tanh %62 : vector<8x32xf32>
    %64 = arith.mulf %59, %63 : vector<8x32xf32>
    %65 = vector.extract_strided_slice %5 {offsets = [16, 0], sizes = [8, 128], strides = [1, 1]} : vector<32x128xf32> to vector<8x128xf32>
    %cst_17 = arith.constant dense<0.000000e+00> : vector<8x128xf32>
    %66 = tpu.matmul %64, %6, %cst_17 {dimension_numbers = #tpu.dot_dimension_numbers<[1], [0], [0], [1], [0, 0, 1, 1], [], []>} : vector<8x32xf32>, vector<32x128xf32>, vector<8x128xf32> -> vector<8x128xf32>
    %67 = arith.addf %65, %66 : vector<8x128xf32>
    %68 = vector.extract_strided_slice %67 {offsets = [0, 0], sizes = [8, 32], strides = [1, 1]} : vector<8x128xf32> to vector<8x32xf32>
    %69 = arith.negf %68 : vector<8x32xf32>
    %70 = math.exp %69 : vector<8x32xf32>
    %cst_18 = arith.constant 1.000000e+00 : f32
    %71 = vector.broadcast %cst_18 : f32 to vector<8x32xf32>
    %72 = arith.addf %71, %70 : vector<8x32xf32>
    %73 = arith.divf %71, %72 : vector<8x32xf32>
    %74 = vector.extract_strided_slice %67 {offsets = [0, 32], sizes = [8, 32], strides = [1, 1]} : vector<8x128xf32> to vector<8x32xf32>
    %75 = arith.negf %74 : vector<8x32xf32>
    %76 = math.exp %75 : vector<8x32xf32>
    %cst_19 = arith.constant 1.000000e+00 : f32
    %77 = vector.broadcast %cst_19 : f32 to vector<8x32xf32>
    %78 = arith.addf %77, %76 : vector<8x32xf32>
    %79 = arith.divf %77, %78 : vector<8x32xf32>
    %80 = vector.extract_strided_slice %67 {offsets = [0, 64], sizes = [8, 32], strides = [1, 1]} : vector<8x128xf32> to vector<8x32xf32>
    %81 = math.tanh %80 : vector<8x32xf32>
    %82 = vector.extract_strided_slice %67 {offsets = [0, 96], sizes = [8, 32], strides = [1, 1]} : vector<8x128xf32> to vector<8x32xf32>
    %83 = arith.negf %82 : vector<8x32xf32>
    %84 = math.exp %83 : vector<8x32xf32>
    %cst_20 = arith.constant 1.000000e+00 : f32
    %85 = vector.broadcast %cst_20 : f32 to vector<8x32xf32>
    %86 = arith.addf %85, %84 : vector<8x32xf32>
    %87 = arith.divf %85, %86 : vector<8x32xf32>
    %88 = arith.mulf %79, %62 : vector<8x32xf32>
    %89 = arith.mulf %73, %81 : vector<8x32xf32>
    %90 = arith.addf %88, %89 : vector<8x32xf32>
    %91 = math.tanh %90 : vector<8x32xf32>
    %92 = arith.mulf %87, %91 : vector<8x32xf32>
    %93 = vector.extract_strided_slice %5 {offsets = [24, 0], sizes = [8, 128], strides = [1, 1]} : vector<32x128xf32> to vector<8x128xf32>
    %cst_21 = arith.constant dense<0.000000e+00> : vector<8x128xf32>
    %94 = tpu.matmul %92, %6, %cst_21 {dimension_numbers = #tpu.dot_dimension_numbers<[1], [0], [0], [1], [0, 0, 1, 1], [], []>} : vector<8x32xf32>, vector<32x128xf32>, vector<8x128xf32> -> vector<8x128xf32>
    %95 = arith.addf %93, %94 : vector<8x128xf32>
    %96 = vector.extract_strided_slice %95 {offsets = [0, 0], sizes = [8, 32], strides = [1, 1]} : vector<8x128xf32> to vector<8x32xf32>
    %97 = arith.negf %96 : vector<8x32xf32>
    %98 = math.exp %97 : vector<8x32xf32>
    %cst_22 = arith.constant 1.000000e+00 : f32
    %99 = vector.broadcast %cst_22 : f32 to vector<8x32xf32>
    %100 = arith.addf %99, %98 : vector<8x32xf32>
    %101 = arith.divf %99, %100 : vector<8x32xf32>
    %102 = vector.extract_strided_slice %95 {offsets = [0, 32], sizes = [8, 32], strides = [1, 1]} : vector<8x128xf32> to vector<8x32xf32>
    %103 = arith.negf %102 : vector<8x32xf32>
    %104 = math.exp %103 : vector<8x32xf32>
    %cst_23 = arith.constant 1.000000e+00 : f32
    %105 = vector.broadcast %cst_23 : f32 to vector<8x32xf32>
    %106 = arith.addf %105, %104 : vector<8x32xf32>
    %107 = arith.divf %105, %106 : vector<8x32xf32>
    %108 = vector.extract_strided_slice %95 {offsets = [0, 64], sizes = [8, 32], strides = [1, 1]} : vector<8x128xf32> to vector<8x32xf32>
    %109 = math.tanh %108 : vector<8x32xf32>
    %110 = vector.extract_strided_slice %95 {offsets = [0, 96], sizes = [8, 32], strides = [1, 1]} : vector<8x128xf32> to vector<8x32xf32>
    %111 = arith.negf %110 : vector<8x32xf32>
    %112 = math.exp %111 : vector<8x32xf32>
    %cst_24 = arith.constant 1.000000e+00 : f32
    %113 = vector.broadcast %cst_24 : f32 to vector<8x32xf32>
    %114 = arith.addf %113, %112 : vector<8x32xf32>
    %115 = arith.divf %113, %114 : vector<8x32xf32>
    %116 = arith.mulf %107, %90 : vector<8x32xf32>
    %117 = arith.mulf %101, %109 : vector<8x32xf32>
    %118 = arith.addf %116, %117 : vector<8x32xf32>
    %119 = math.tanh %118 : vector<8x32xf32>
    %120 = arith.mulf %115, %119 : vector<8x32xf32>
    %c0_25 = arith.constant 0 : index
    %c0_26 = arith.constant 0 : index
    %121 = vector.load %arg2[%c0_25, %c0_26] : memref<2x16xi32, #tpu.memory_space<vmem>>, vector<1x16xi32>
    %c1 = arith.constant 1 : index
    %c0_27 = arith.constant 0 : index
    %122 = vector.load %arg2[%c1, %c0_27] : memref<2x16xi32, #tpu.memory_space<vmem>>, vector<1x16xi32>
    %123 = tpu.iota {dimensions = array<i32: 0>} : vector<8x16xi32>
    %124 = vector.broadcast %122 : vector<1x16xi32> to vector<8x16xi32>
    %125 = arith.cmpi eq, %123, %124 : vector<8x16xi32>
    %126 = arith.extui %125 : vector<8x16xi1> to vector<8x16xi32>
    %127 = arith.sitofp %126 : vector<8x16xi32> to vector<8x16xf32>
    %128 = vector.broadcast %121 : vector<1x16xi32> to vector<8x16xi32>
    %129 = arith.cmpi eq, %123, %128 : vector<8x16xi32>
    %130 = arith.extui %129 : vector<8x16xi1> to vector<8x16xi32>
    %131 = arith.sitofp %130 : vector<8x16xi32> to vector<8x16xf32>
    %cst_28 = arith.constant dense<0.000000e+00> : vector<8x8xf32>
    %132 = tpu.matmul %127, %131, %cst_28 {dimension_numbers = #tpu.dot_dimension_numbers<[1], [1], [0], [0], [0, 0, 1, 0], [], []>} : vector<8x16xf32>, vector<8x16xf32>, vector<8x8xf32> -> vector<8x8xf32>
    %cst_29 = arith.constant 0.000000e+00 : f32
    %133 = vector.broadcast %cst_29 : f32 to vector<8x8xf32>
    %134 = arith.cmpf ogt, %132, %133 : vector<8x8xf32>
    %135 = arith.extui %134 : vector<8x8xi1> to vector<8x8xi32>
    %136 = arith.sitofp %135 : vector<8x8xi32> to vector<8x8xf32>
    %c0_30 = arith.constant 0 : index
    %c0_31 = arith.constant 0 : index
    %137 = vector.load %arg3[%c0_30, %c0_31] : memref<8x1xi32, #tpu.memory_space<vmem>>, vector<8x1xi32>
    %138 = tpu.iota {dimensions = array<i32: 1>} : vector<8x8xi32>
    %139 = vector.broadcast %137 : vector<8x1xi32> to vector<8x8xi32>
    %140 = arith.cmpi eq, %138, %139 : vector<8x8xi32>
    %141 = arith.extui %140 : vector<8x8xi1> to vector<8x8xi32>
    %142 = arith.sitofp %141 : vector<8x8xi32> to vector<8x8xf32>
    %c0_32 = arith.constant 0 : index
    %c0_33 = arith.constant 0 : index
    %143 = vector.load %arg4[%c0_32, %c0_33] : memref<8x8xf32, #tpu.memory_space<vmem>>, vector<8x8xf32>
    %cst_34 = arith.constant dense<0.000000e+00> : vector<8x8xf32>
    %144 = tpu.matmul %142, %143, %cst_34 {dimension_numbers = #tpu.dot_dimension_numbers<[1], [0], [0], [1], [0, 0, 1, 1], [], []>} : vector<8x8xf32>, vector<8x8xf32>, vector<8x8xf32> -> vector<8x8xf32>
    %c0_35 = arith.constant 0 : index
    %c0_36 = arith.constant 0 : index
    %145 = vector.load %arg9[%c0_35, %c0_36] : memref<32x512xf32, #tpu.memory_space<vmem>>, vector<32x512xf32>
    %cst_37 = arith.constant dense<0.000000e+00> : vector<8x512xf32>
    %146 = tpu.matmul %120, %145, %cst_37 {dimension_numbers = #tpu.dot_dimension_numbers<[1], [0], [0], [1], [0, 0, 1, 1], [], []>} : vector<8x32xf32>, vector<32x512xf32>, vector<8x512xf32> -> vector<8x512xf32>
    %c0_38 = arith.constant 0 : index
    %c0_39 = arith.constant 0 : index
    %147 = vector.load %arg10[%c0_38, %c0_39] : memref<8x512xf32, #tpu.memory_space<vmem>>, vector<8x512xf32>
    %cst_40 = arith.constant dense<0.000000e+00> : vector<8x512xf32>
    %148 = tpu.matmul %144, %147, %cst_40 {dimension_numbers = #tpu.dot_dimension_numbers<[1], [0], [0], [1], [0, 0, 1, 1], [], []>} : vector<8x8xf32>, vector<8x512xf32>, vector<8x512xf32> -> vector<8x512xf32>
    %149 = arith.addf %146, %148 : vector<8x512xf32>
    %c0_41 = arith.constant 0 : index
    %c0_42 = arith.constant 0 : index
    %150 = vector.load %arg11[%c0_41, %c0_42] : memref<1x512xf32, #tpu.memory_space<vmem>>, vector<1x512xf32>
    %151 = vector.broadcast %150 : vector<1x512xf32> to vector<8x512xf32>
    %152 = arith.addf %149, %151 : vector<8x512xf32>
    %c0_43 = arith.constant 0 : index
    %c0_44 = arith.constant 0 : index
    %153 = vector.load %arg12[%c0_43, %c0_44] : memref<128x32xf32, #tpu.memory_space<vmem>>, vector<128x32xf32>
    %c0_45 = arith.constant 0 : index
    %c0_46 = arith.constant 0 : index
    %154 = vector.load %arg13[%c0_45, %c0_46] : memref<1x32xf32, #tpu.memory_space<vmem>>, vector<1x32xf32>
    %155 = vector.extract_strided_slice %152 {offsets = [0, 384], sizes = [8, 128], strides = [1, 1]} : vector<8x512xf32> to vector<8x128xf32>
    %cst_47 = arith.constant dense<0.000000e+00> : vector<8x32xf32>
    %156 = tpu.matmul %155, %153, %cst_47 {dimension_numbers = #tpu.dot_dimension_numbers<[1], [0], [0], [1], [0, 0, 1, 1], [], []>} : vector<8x128xf32>, vector<128x32xf32>, vector<8x32xf32> -> vector<8x32xf32>
    %157 = vector.broadcast %154 : vector<1x32xf32> to vector<8x32xf32>
    %158 = arith.addf %157, %156 : vector<8x32xf32>
    %159 = vector.extract_strided_slice %152 {offsets = [0, 0], sizes = [8, 32], strides = [1, 1]} : vector<8x512xf32> to vector<8x32xf32>
    %160 = vector.extract_strided_slice %152 {offsets = [0, 128], sizes = [8, 32], strides = [1, 1]} : vector<8x512xf32> to vector<8x32xf32>
    %161 = vector.extract_strided_slice %152 {offsets = [0, 256], sizes = [8, 32], strides = [1, 1]} : vector<8x512xf32> to vector<8x32xf32>
    %cst_48 = arith.constant dense<0.000000e+00> : vector<8x8xf32>
    %162 = tpu.matmul %159, %160, %cst_48 {dimension_numbers = #tpu.dot_dimension_numbers<[1], [1], [0], [0], [0, 0, 1, 0], [], []>} : vector<8x32xf32>, vector<8x32xf32>, vector<8x8xf32> -> vector<8x8xf32>
    %cst_49 = arith.constant 0.176776692 : f32
    %163 = vector.broadcast %cst_49 : f32 to vector<8x8xf32>
    %164 = arith.mulf %162, %163 : vector<8x8xf32>
    %cst_50 = arith.constant 0.000000e+00 : f32
    %165 = vector.broadcast %cst_50 : f32 to vector<8x8xf32>
    %166 = arith.cmpf ogt, %136, %165 : vector<8x8xf32>
    %cst_51 = arith.constant -1.000000e+30 : f32
    %167 = vector.broadcast %cst_51 : f32 to vector<8x8xf32>
    %168 = arith.select %166, %164, %167 : vector<8x8xi1>, vector<8x8xf32>
    %cst_52 = arith.constant dense<0xFF800000> : vector<8xf32>
    %169 = vector.multi_reduction <maximumf>, %168, %cst_52 [1] : vector<8x8xf32> to vector<8xf32>
    %170 = vector.shape_cast %169 : vector<8xf32> to vector<8x1xf32>
    %171 = vector.broadcast %170 : vector<8x1xf32> to vector<8x8xf32>
    %172 = arith.subf %168, %171 : vector<8x8xf32>
    %173 = math.exp %172 : vector<8x8xf32>
    %174 = arith.mulf %173, %136 : vector<8x8xf32>
    %cst_53 = arith.constant dense<0.000000e+00> : vector<8xf32>
    %175 = vector.multi_reduction <add>, %174, %cst_53 [1] : vector<8x8xf32> to vector<8xf32>
    %176 = vector.shape_cast %175 : vector<8xf32> to vector<8x1xf32>
    %cst_54 = arith.constant 1.000000e-30 : f32
    %177 = vector.broadcast %cst_54 : f32 to vector<8x1xf32>
    %178 = arith.maximumf %176, %177 : vector<8x1xf32>
    %179 = tpu.reciprocal %178 {approx = true} : vector<8x1xf32> -> vector<8x1xf32>
    %180 = vector.broadcast %179 : vector<8x1xf32> to vector<8x8xf32>
    %181 = arith.mulf %174, %180 : vector<8x8xf32>
    %cst_55 = arith.constant dense<0.000000e+00> : vector<8x32xf32>
    %182 = tpu.matmul %181, %161, %cst_55 {dimension_numbers = #tpu.dot_dimension_numbers<[1], [0], [0], [1], [0, 0, 1, 1], [], []>} : vector<8x8xf32>, vector<8x32xf32>, vector<8x32xf32> -> vector<8x32xf32>
    %183 = vector.extract_strided_slice %153 {offsets = [0, 0], sizes = [32, 32], strides = [1, 1]} : vector<128x32xf32> to vector<32x32xf32>
    %cst_56 = arith.constant dense<0.000000e+00> : vector<8x32xf32>
    %184 = tpu.matmul %182, %183, %cst_56 {dimension_numbers = #tpu.dot_dimension_numbers<[1], [0], [0], [1], [0, 0, 1, 1], [], []>} : vector<8x32xf32>, vector<32x32xf32>, vector<8x32xf32> -> vector<8x32xf32>
    %185 = arith.addf %158, %184 : vector<8x32xf32>
    %186 = vector.extract_strided_slice %152 {offsets = [0, 32], sizes = [8, 32], strides = [1, 1]} : vector<8x512xf32> to vector<8x32xf32>
    %187 = vector.extract_strided_slice %152 {offsets = [0, 160], sizes = [8, 32], strides = [1, 1]} : vector<8x512xf32> to vector<8x32xf32>
    %188 = vector.extract_strided_slice %152 {offsets = [0, 288], sizes = [8, 32], strides = [1, 1]} : vector<8x512xf32> to vector<8x32xf32>
    %cst_57 = arith.constant dense<0.000000e+00> : vector<8x8xf32>
    %189 = tpu.matmul %186, %187, %cst_57 {dimension_numbers = #tpu.dot_dimension_numbers<[1], [1], [0], [0], [0, 0, 1, 0], [], []>} : vector<8x32xf32>, vector<8x32xf32>, vector<8x8xf32> -> vector<8x8xf32>
    %cst_58 = arith.constant 0.176776692 : f32
    %190 = vector.broadcast %cst_58 : f32 to vector<8x8xf32>
    %191 = arith.mulf %189, %190 : vector<8x8xf32>
    %cst_59 = arith.constant 0.000000e+00 : f32
    %192 = vector.broadcast %cst_59 : f32 to vector<8x8xf32>
    %193 = arith.cmpf ogt, %136, %192 : vector<8x8xf32>
    %cst_60 = arith.constant -1.000000e+30 : f32
    %194 = vector.broadcast %cst_60 : f32 to vector<8x8xf32>
    %195 = arith.select %193, %191, %194 : vector<8x8xi1>, vector<8x8xf32>
    %cst_61 = arith.constant dense<0xFF800000> : vector<8xf32>
    %196 = vector.multi_reduction <maximumf>, %195, %cst_61 [1] : vector<8x8xf32> to vector<8xf32>
    %197 = vector.shape_cast %196 : vector<8xf32> to vector<8x1xf32>
    %198 = vector.broadcast %197 : vector<8x1xf32> to vector<8x8xf32>
    %199 = arith.subf %195, %198 : vector<8x8xf32>
    %200 = math.exp %199 : vector<8x8xf32>
    %201 = arith.mulf %200, %136 : vector<8x8xf32>
    %cst_62 = arith.constant dense<0.000000e+00> : vector<8xf32>
    %202 = vector.multi_reduction <add>, %201, %cst_62 [1] : vector<8x8xf32> to vector<8xf32>
    %203 = vector.shape_cast %202 : vector<8xf32> to vector<8x1xf32>
    %cst_63 = arith.constant 1.000000e-30 : f32
    %204 = vector.broadcast %cst_63 : f32 to vector<8x1xf32>
    %205 = arith.maximumf %203, %204 : vector<8x1xf32>
    %206 = tpu.reciprocal %205 {approx = true} : vector<8x1xf32> -> vector<8x1xf32>
    %207 = vector.broadcast %206 : vector<8x1xf32> to vector<8x8xf32>
    %208 = arith.mulf %201, %207 : vector<8x8xf32>
    %cst_64 = arith.constant dense<0.000000e+00> : vector<8x32xf32>
    %209 = tpu.matmul %208, %188, %cst_64 {dimension_numbers = #tpu.dot_dimension_numbers<[1], [0], [0], [1], [0, 0, 1, 1], [], []>} : vector<8x8xf32>, vector<8x32xf32>, vector<8x32xf32> -> vector<8x32xf32>
    %210 = vector.extract_strided_slice %153 {offsets = [32, 0], sizes = [32, 32], strides = [1, 1]} : vector<128x32xf32> to vector<32x32xf32>
    %cst_65 = arith.constant dense<0.000000e+00> : vector<8x32xf32>
    %211 = tpu.matmul %209, %210, %cst_65 {dimension_numbers = #tpu.dot_dimension_numbers<[1], [0], [0], [1], [0, 0, 1, 1], [], []>} : vector<8x32xf32>, vector<32x32xf32>, vector<8x32xf32> -> vector<8x32xf32>
    %212 = arith.addf %185, %211 : vector<8x32xf32>
    %213 = vector.extract_strided_slice %152 {offsets = [0, 64], sizes = [8, 32], strides = [1, 1]} : vector<8x512xf32> to vector<8x32xf32>
    %214 = vector.extract_strided_slice %152 {offsets = [0, 192], sizes = [8, 32], strides = [1, 1]} : vector<8x512xf32> to vector<8x32xf32>
    %215 = vector.extract_strided_slice %152 {offsets = [0, 320], sizes = [8, 32], strides = [1, 1]} : vector<8x512xf32> to vector<8x32xf32>
    %cst_66 = arith.constant dense<0.000000e+00> : vector<8x8xf32>
    %216 = tpu.matmul %213, %214, %cst_66 {dimension_numbers = #tpu.dot_dimension_numbers<[1], [1], [0], [0], [0, 0, 1, 0], [], []>} : vector<8x32xf32>, vector<8x32xf32>, vector<8x8xf32> -> vector<8x8xf32>
    %cst_67 = arith.constant 0.176776692 : f32
    %217 = vector.broadcast %cst_67 : f32 to vector<8x8xf32>
    %218 = arith.mulf %216, %217 : vector<8x8xf32>
    %cst_68 = arith.constant 0.000000e+00 : f32
    %219 = vector.broadcast %cst_68 : f32 to vector<8x8xf32>
    %220 = arith.cmpf ogt, %136, %219 : vector<8x8xf32>
    %cst_69 = arith.constant -1.000000e+30 : f32
    %221 = vector.broadcast %cst_69 : f32 to vector<8x8xf32>
    %222 = arith.select %220, %218, %221 : vector<8x8xi1>, vector<8x8xf32>
    %cst_70 = arith.constant dense<0xFF800000> : vector<8xf32>
    %223 = vector.multi_reduction <maximumf>, %222, %cst_70 [1] : vector<8x8xf32> to vector<8xf32>
    %224 = vector.shape_cast %223 : vector<8xf32> to vector<8x1xf32>
    %225 = vector.broadcast %224 : vector<8x1xf32> to vector<8x8xf32>
    %226 = arith.subf %222, %225 : vector<8x8xf32>
    %227 = math.exp %226 : vector<8x8xf32>
    %228 = arith.mulf %227, %136 : vector<8x8xf32>
    %cst_71 = arith.constant dense<0.000000e+00> : vector<8xf32>
    %229 = vector.multi_reduction <add>, %228, %cst_71 [1] : vector<8x8xf32> to vector<8xf32>
    %230 = vector.shape_cast %229 : vector<8xf32> to vector<8x1xf32>
    %cst_72 = arith.constant 1.000000e-30 : f32
    %231 = vector.broadcast %cst_72 : f32 to vector<8x1xf32>
    %232 = arith.maximumf %230, %231 : vector<8x1xf32>
    %233 = tpu.reciprocal %232 {approx = true} : vector<8x1xf32> -> vector<8x1xf32>
    %234 = vector.broadcast %233 : vector<8x1xf32> to vector<8x8xf32>
    %235 = arith.mulf %228, %234 : vector<8x8xf32>
    %cst_73 = arith.constant dense<0.000000e+00> : vector<8x32xf32>
    %236 = tpu.matmul %235, %215, %cst_73 {dimension_numbers = #tpu.dot_dimension_numbers<[1], [0], [0], [1], [0, 0, 1, 1], [], []>} : vector<8x8xf32>, vector<8x32xf32>, vector<8x32xf32> -> vector<8x32xf32>
    %237 = vector.extract_strided_slice %153 {offsets = [64, 0], sizes = [32, 32], strides = [1, 1]} : vector<128x32xf32> to vector<32x32xf32>
    %cst_74 = arith.constant dense<0.000000e+00> : vector<8x32xf32>
    %238 = tpu.matmul %236, %237, %cst_74 {dimension_numbers = #tpu.dot_dimension_numbers<[1], [0], [0], [1], [0, 0, 1, 1], [], []>} : vector<8x32xf32>, vector<32x32xf32>, vector<8x32xf32> -> vector<8x32xf32>
    %239 = arith.addf %212, %238 : vector<8x32xf32>
    %240 = vector.extract_strided_slice %152 {offsets = [0, 96], sizes = [8, 32], strides = [1, 1]} : vector<8x512xf32> to vector<8x32xf32>
    %241 = vector.extract_strided_slice %152 {offsets = [0, 224], sizes = [8, 32], strides = [1, 1]} : vector<8x512xf32> to vector<8x32xf32>
    %242 = vector.extract_strided_slice %152 {offsets = [0, 352], sizes = [8, 32], strides = [1, 1]} : vector<8x512xf32> to vector<8x32xf32>
    %cst_75 = arith.constant dense<0.000000e+00> : vector<8x8xf32>
    %243 = tpu.matmul %240, %241, %cst_75 {dimension_numbers = #tpu.dot_dimension_numbers<[1], [1], [0], [0], [0, 0, 1, 0], [], []>} : vector<8x32xf32>, vector<8x32xf32>, vector<8x8xf32> -> vector<8x8xf32>
    %cst_76 = arith.constant 0.176776692 : f32
    %244 = vector.broadcast %cst_76 : f32 to vector<8x8xf32>
    %245 = arith.mulf %243, %244 : vector<8x8xf32>
    %cst_77 = arith.constant 0.000000e+00 : f32
    %246 = vector.broadcast %cst_77 : f32 to vector<8x8xf32>
    %247 = arith.cmpf ogt, %136, %246 : vector<8x8xf32>
    %cst_78 = arith.constant -1.000000e+30 : f32
    %248 = vector.broadcast %cst_78 : f32 to vector<8x8xf32>
    %249 = arith.select %247, %245, %248 : vector<8x8xi1>, vector<8x8xf32>
    %cst_79 = arith.constant dense<0xFF800000> : vector<8xf32>
    %250 = vector.multi_reduction <maximumf>, %249, %cst_79 [1] : vector<8x8xf32> to vector<8xf32>
    %251 = vector.shape_cast %250 : vector<8xf32> to vector<8x1xf32>
    %252 = vector.broadcast %251 : vector<8x1xf32> to vector<8x8xf32>
    %253 = arith.subf %249, %252 : vector<8x8xf32>
    %254 = math.exp %253 : vector<8x8xf32>
    %255 = arith.mulf %254, %136 : vector<8x8xf32>
    %cst_80 = arith.constant dense<0.000000e+00> : vector<8xf32>
    %256 = vector.multi_reduction <add>, %255, %cst_80 [1] : vector<8x8xf32> to vector<8xf32>
    %257 = vector.shape_cast %256 : vector<8xf32> to vector<8x1xf32>
    %cst_81 = arith.constant 1.000000e-30 : f32
    %258 = vector.broadcast %cst_81 : f32 to vector<8x1xf32>
    %259 = arith.maximumf %257, %258 : vector<8x1xf32>
    %260 = tpu.reciprocal %259 {approx = true} : vector<8x1xf32> -> vector<8x1xf32>
    %261 = vector.broadcast %260 : vector<8x1xf32> to vector<8x8xf32>
    %262 = arith.mulf %255, %261 : vector<8x8xf32>
    %cst_82 = arith.constant dense<0.000000e+00> : vector<8x32xf32>
    %263 = tpu.matmul %262, %242, %cst_82 {dimension_numbers = #tpu.dot_dimension_numbers<[1], [0], [0], [1], [0, 0, 1, 1], [], []>} : vector<8x8xf32>, vector<8x32xf32>, vector<8x32xf32> -> vector<8x32xf32>
    %264 = vector.extract_strided_slice %153 {offsets = [96, 0], sizes = [32, 32], strides = [1, 1]} : vector<128x32xf32> to vector<32x32xf32>
    %cst_83 = arith.constant dense<0.000000e+00> : vector<8x32xf32>
    %265 = tpu.matmul %263, %264, %cst_83 {dimension_numbers = #tpu.dot_dimension_numbers<[1], [0], [0], [1], [0, 0, 1, 1], [], []>} : vector<8x32xf32>, vector<32x32xf32>, vector<8x32xf32> -> vector<8x32xf32>
    %266 = arith.addf %239, %265 : vector<8x32xf32>
    %cst_84 = arith.constant dense<0.000000e+00> : vector<32xf32>
    %267 = vector.multi_reduction <add>, %266, %cst_84 [0] : vector<8x32xf32> to vector<32xf32>
    %268 = vector.shape_cast %267 : vector<32xf32> to vector<1x32xf32>
    %cst_85 = arith.constant 8.000000e+00 : f32
    %269 = vector.broadcast %cst_85 : f32 to vector<1x32xf32>
    %270 = arith.divf %268, %269 : vector<1x32xf32>
    %271 = vector.broadcast %270 : vector<1x32xf32> to vector<8x32xf32>
    %272 = arith.subf %266, %271 : vector<8x32xf32>
    %273 = arith.mulf %272, %272 : vector<8x32xf32>
    %cst_86 = arith.constant dense<0.000000e+00> : vector<32xf32>
    %274 = vector.multi_reduction <add>, %273, %cst_86 [0] : vector<8x32xf32> to vector<32xf32>
    %275 = vector.shape_cast %274 : vector<32xf32> to vector<1x32xf32>
    %cst_87 = arith.constant 8.000000e+00 : f32
    %276 = vector.broadcast %cst_87 : f32 to vector<1x32xf32>
    %277 = arith.divf %275, %276 : vector<1x32xf32>
    %278 = vector.broadcast %270 : vector<1x32xf32> to vector<8x32xf32>
    %279 = arith.subf %266, %278 : vector<8x32xf32>
    %cst_88 = arith.constant 9.99999974E-6 : f32
    %280 = vector.broadcast %cst_88 : f32 to vector<1x32xf32>
    %281 = arith.addf %277, %280 : vector<1x32xf32>
    %282 = math.rsqrt %281 : vector<1x32xf32>
    %283 = vector.broadcast %282 : vector<1x32xf32> to vector<8x32xf32>
    %284 = arith.mulf %279, %283 : vector<8x32xf32>
    %c0_89 = arith.constant 0 : index
    %c0_90 = arith.constant 0 : index
    %285 = vector.load %arg14[%c0_89, %c0_90] : memref<1x32xf32, #tpu.memory_space<vmem>>, vector<1x32xf32>
    %286 = vector.broadcast %285 : vector<1x32xf32> to vector<8x32xf32>
    %287 = arith.mulf %284, %286 : vector<8x32xf32>
    %c0_91 = arith.constant 0 : index
    %c0_92 = arith.constant 0 : index
    %288 = vector.load %arg15[%c0_91, %c0_92] : memref<1x32xf32, #tpu.memory_space<vmem>>, vector<1x32xf32>
    %289 = vector.broadcast %288 : vector<1x32xf32> to vector<8x32xf32>
    %290 = arith.addf %287, %289 : vector<8x32xf32>
    %cst_93 = arith.constant 0.000000e+00 : f32
    %291 = vector.broadcast %cst_93 : f32 to vector<8x32xf32>
    %292 = arith.cmpf oge, %290, %291 : vector<8x32xf32>
    %cst_94 = arith.constant 0.00999999977 : f32
    %293 = vector.broadcast %cst_94 : f32 to vector<8x32xf32>
    %294 = arith.mulf %293, %290 : vector<8x32xf32>
    %295 = arith.select %292, %290, %294 : vector<8x32xi1>, vector<8x32xf32>
    %c0_95 = arith.constant 0 : index
    %c0_96 = arith.constant 0 : index
    %296 = vector.load %arg16[%c0_95, %c0_96] : memref<32x128xf32, #tpu.memory_space<vmem>>, vector<32x128xf32>
    %cst_97 = arith.constant dense<0.000000e+00> : vector<8x128xf32>
    %297 = tpu.matmul %295, %296, %cst_97 {dimension_numbers = #tpu.dot_dimension_numbers<[1], [0], [0], [1], [0, 0, 1, 1], [], []>} : vector<8x32xf32>, vector<32x128xf32>, vector<8x128xf32> -> vector<8x128xf32>
    %c0_98 = arith.constant 0 : index
    %c0_99 = arith.constant 0 : index
    %298 = vector.load %arg17[%c0_98, %c0_99] : memref<32x128xf32, #tpu.memory_space<vmem>>, vector<32x128xf32>
    %cst_100 = arith.constant dense<0.000000e+00> : vector<8x128xf32>
    %299 = tpu.matmul %120, %298, %cst_100 {dimension_numbers = #tpu.dot_dimension_numbers<[1], [0], [0], [1], [0, 0, 1, 1], [], []>} : vector<8x32xf32>, vector<32x128xf32>, vector<8x128xf32> -> vector<8x128xf32>
    %300 = arith.addf %297, %299 : vector<8x128xf32>
    %c0_101 = arith.constant 0 : index
    %c0_102 = arith.constant 0 : index
    %301 = vector.load %arg18[%c0_101, %c0_102] : memref<8x128xf32, #tpu.memory_space<vmem>>, vector<8x128xf32>
    %cst_103 = arith.constant dense<0.000000e+00> : vector<8x128xf32>
    %302 = tpu.matmul %144, %301, %cst_103 {dimension_numbers = #tpu.dot_dimension_numbers<[1], [0], [0], [1], [0, 0, 1, 1], [], []>} : vector<8x8xf32>, vector<8x128xf32>, vector<8x128xf32> -> vector<8x128xf32>
    %303 = arith.addf %300, %302 : vector<8x128xf32>
    %c0_104 = arith.constant 0 : index
    %c0_105 = arith.constant 0 : index
    %304 = vector.load %arg19[%c0_104, %c0_105] : memref<1x128xf32, #tpu.memory_space<vmem>>, vector<1x128xf32>
    %305 = vector.broadcast %304 : vector<1x128xf32> to vector<8x128xf32>
    %306 = arith.addf %303, %305 : vector<8x128xf32>
    %307 = vector.extract_strided_slice %306 {offsets = [0, 0], sizes = [8, 32], strides = [1, 1]} : vector<8x128xf32> to vector<8x32xf32>
    %308 = vector.extract_strided_slice %306 {offsets = [0, 32], sizes = [8, 32], strides = [1, 1]} : vector<8x128xf32> to vector<8x32xf32>
    %309 = vector.extract_strided_slice %306 {offsets = [0, 64], sizes = [8, 32], strides = [1, 1]} : vector<8x128xf32> to vector<8x32xf32>
    %cst_106 = arith.constant dense<0.000000e+00> : vector<8x8xf32>
    %310 = tpu.matmul %307, %308, %cst_106 {dimension_numbers = #tpu.dot_dimension_numbers<[1], [1], [0], [0], [0, 0, 1, 0], [], []>} : vector<8x32xf32>, vector<8x32xf32>, vector<8x8xf32> -> vector<8x8xf32>
    %cst_107 = arith.constant 0.176776692 : f32
    %311 = vector.broadcast %cst_107 : f32 to vector<8x8xf32>
    %312 = arith.mulf %310, %311 : vector<8x8xf32>
    %cst_108 = arith.constant 0.000000e+00 : f32
    %313 = vector.broadcast %cst_108 : f32 to vector<8x8xf32>
    %314 = arith.cmpf ogt, %136, %313 : vector<8x8xf32>
    %cst_109 = arith.constant -1.000000e+30 : f32
    %315 = vector.broadcast %cst_109 : f32 to vector<8x8xf32>
    %316 = arith.select %314, %312, %315 : vector<8x8xi1>, vector<8x8xf32>
    %cst_110 = arith.constant dense<0xFF800000> : vector<8xf32>
    %317 = vector.multi_reduction <maximumf>, %316, %cst_110 [1] : vector<8x8xf32> to vector<8xf32>
    %318 = vector.shape_cast %317 : vector<8xf32> to vector<8x1xf32>
    %319 = vector.broadcast %318 : vector<8x1xf32> to vector<8x8xf32>
    %320 = arith.subf %316, %319 : vector<8x8xf32>
    %321 = math.exp %320 : vector<8x8xf32>
    %322 = arith.mulf %321, %136 : vector<8x8xf32>
    %cst_111 = arith.constant dense<0.000000e+00> : vector<8xf32>
    %323 = vector.multi_reduction <add>, %322, %cst_111 [1] : vector<8x8xf32> to vector<8xf32>
    %324 = vector.shape_cast %323 : vector<8xf32> to vector<8x1xf32>
    %cst_112 = arith.constant 1.000000e-30 : f32
    %325 = vector.broadcast %cst_112 : f32 to vector<8x1xf32>
    %326 = arith.maximumf %324, %325 : vector<8x1xf32>
    %327 = tpu.reciprocal %326 {approx = true} : vector<8x1xf32> -> vector<8x1xf32>
    %328 = vector.broadcast %327 : vector<8x1xf32> to vector<8x8xf32>
    %329 = arith.mulf %322, %328 : vector<8x8xf32>
    %cst_113 = arith.constant dense<0.000000e+00> : vector<8x32xf32>
    %330 = tpu.matmul %329, %309, %cst_113 {dimension_numbers = #tpu.dot_dimension_numbers<[1], [0], [0], [1], [0, 0, 1, 1], [], []>} : vector<8x8xf32>, vector<8x32xf32>, vector<8x32xf32> -> vector<8x32xf32>
    %331 = vector.extract_strided_slice %306 {offsets = [0, 96], sizes = [8, 32], strides = [1, 1]} : vector<8x128xf32> to vector<8x32xf32>
    %332 = arith.addf %330, %331 : vector<8x32xf32>
    %c0_114 = arith.constant 0 : index
    %333 = memref.load %arg0[%c0_114] : memref<1xi32, #tpu.memory_space<smem>>
    %334 = vector.broadcast %333 : i32 to vector<8x1xi32>
    %335 = arith.cmpi eq, %137, %334 : vector<8x1xi32>
    %336 = arith.extui %335 : vector<8x1xi1> to vector<8x1xi32>
    %337 = arith.sitofp %336 : vector<8x1xi32> to vector<8x1xf32>
    %338 = vector.broadcast %337 : vector<8x1xf32> to vector<8x32xf32>
    %339 = arith.mulf %338, %332 : vector<8x32xf32>
    %cst_115 = arith.constant dense<0.000000e+00> : vector<32xf32>
    %340 = vector.multi_reduction <add>, %339, %cst_115 [0] : vector<8x32xf32> to vector<32xf32>
    %341 = vector.shape_cast %340 : vector<32xf32> to vector<1x32xf32>
    %c0_116 = arith.constant 0 : index
    %c0_117 = arith.constant 0 : index
    %342 = vector.load %arg20[%c0_116, %c0_117] : memref<32x32xf32, #tpu.memory_space<vmem>>, vector<32x32xf32>
    %cst_118 = arith.constant dense<0.000000e+00> : vector<1x32xf32>
    %343 = tpu.matmul %341, %342, %cst_118 {dimension_numbers = #tpu.dot_dimension_numbers<[1], [0], [0], [1], [0, 0, 1, 1], [], []>} : vector<1x32xf32>, vector<32x32xf32>, vector<1x32xf32> -> vector<1x32xf32>
    %c0_119 = arith.constant 0 : index
    %c0_120 = arith.constant 0 : index
    %344 = vector.load %arg21[%c0_119, %c0_120] : memref<1x32xf32, #tpu.memory_space<vmem>>, vector<1x32xf32>
    %345 = arith.addf %343, %344 : vector<1x32xf32>
    %cst_121 = arith.constant 0.000000e+00 : f32
    %346 = vector.broadcast %cst_121 : f32 to vector<1x32xf32>
    %347 = arith.cmpf oge, %345, %346 : vector<1x32xf32>
    %cst_122 = arith.constant 0.00999999977 : f32
    %348 = vector.broadcast %cst_122 : f32 to vector<1x32xf32>
    %349 = arith.mulf %348, %345 : vector<1x32xf32>
    %350 = arith.select %347, %345, %349 : vector<1x32xi1>, vector<1x32xf32>
    %c0_123 = arith.constant 0 : index
    %c0_124 = arith.constant 0 : index
    %351 = vector.load %arg22[%c0_123, %c0_124] : memref<32x4xf32, #tpu.memory_space<vmem>>, vector<32x4xf32>
    %cst_125 = arith.constant dense<0.000000e+00> : vector<1x4xf32>
    %352 = tpu.matmul %350, %351, %cst_125 {dimension_numbers = #tpu.dot_dimension_numbers<[1], [0], [0], [1], [0, 0, 1, 1], [], []>} : vector<1x32xf32>, vector<32x4xf32>, vector<1x4xf32> -> vector<1x4xf32>
    %c0_126 = arith.constant 0 : index
    %c0_127 = arith.constant 0 : index
    %353 = vector.load %arg23[%c0_126, %c0_127] : memref<1x4xf32, #tpu.memory_space<vmem>>, vector<1x4xf32>
    %354 = arith.addf %352, %353 : vector<1x4xf32>
    %355 = tpu.iota {dimensions = array<i32: 1>} : vector<1x8xi32>
    %356 = vector.broadcast %333 : i32 to vector<1x8xi32>
    %357 = arith.cmpi eq, %355, %356 : vector<1x8xi32>
    %358 = arith.extui %357 : vector<1x8xi1> to vector<1x8xi32>
    %359 = arith.sitofp %358 : vector<1x8xi32> to vector<1x8xf32>
    %c0_128 = arith.constant 0 : index
    %c0_129 = arith.constant 0 : index
    %360 = vector.load %arg5[%c0_128, %c0_129] : memref<8x4xf32, #tpu.memory_space<vmem>>, vector<8x4xf32>
    %cst_130 = arith.constant dense<0.000000e+00> : vector<1x4xf32>
    %361 = tpu.matmul %359, %360, %cst_130 {dimension_numbers = #tpu.dot_dimension_numbers<[1], [0], [0], [1], [0, 0, 1, 1], [], []>} : vector<1x8xf32>, vector<8x4xf32>, vector<1x4xf32> -> vector<1x4xf32>
    %cst_131 = arith.constant 1.000000e+00 : f32
    %362 = vector.broadcast %cst_131 : f32 to vector<1x4xf32>
    %363 = arith.subf %362, %361 : vector<1x4xf32>
    %cst_132 = arith.constant -1.000000e+09 : f32
    %364 = vector.broadcast %cst_132 : f32 to vector<1x4xf32>
    %365 = arith.mulf %363, %364 : vector<1x4xf32>
    %366 = arith.addf %354, %365 : vector<1x4xf32>
    %c0_133 = arith.constant 0 : index
    %c0_134 = arith.constant 0 : index
    %367 = vector.load %arg24[%c0_133, %c0_134] : memref<1x4xf32, #tpu.memory_space<vmem>>, vector<1x4xf32>
    tpu.vector_store %arg24[%c0_133, %c0_134], %366 {strides = array<i32>} : memref<1x4xf32, #tpu.memory_space<vmem>>, vector<1x4xf32>,
    return
  }
}

</mosaic_0001>

<bundles_post_ra>
// kernel: policy_network_forward.1
= control target key start
LH: loop header
LB: loop body
LE: loop exit
PB: predicated region body
PF: predicated region fallthrough
CT: control target
= control target key end

     0   :  { %s4521_s0 = inlined_call_operand.<no memory space> [shape: s32[1], index: 0, kind: input, shape index: {}]   ;;  %s4522_s1 = inlined_call_operand.vmem [shape: f32[32,8], index: 1, kind: input, shape index: {}]   ;;  %s4523_s2 = inlined_call_operand.vmem [shape: s32[2,16], index: 2, kind: input, shape index: {}]   ;;  %s4524_s3 = inlined_call_operand.vmem [shape: s32[8,1], index: 3, kind: input, shape index: {}]   ;;  %s4525_s4 = inlined_call_operand.vmem [shape: f32[8,8], index: 4, kind: input, shape index: {}]   ;;  %s4526_s5 = inlined_call_operand.vmem [shape: f32[8,4], index: 5, kind: input, shape index: {}]   ;;  %s4527_s6 = inlined_call_operand.vmem [shape: f32[8,128], index: 6, kind: input, shape index: {}]   ;;  %s4528_s7 = inlined_call_operand.vmem [shape: f32[32,128], index: 7, kind: input, shape index: {}]   ;;  %s4529_s8 = inlined_call_operand.vmem [shape: f32[1,128], index: 8, kind: input, shape index: {}]   ;;  %s4530_s9 = inlined_call_operand.vmem [shape: f32[32,512], index: 9, kind: input, shape index: {}]   ;;  %s4531_s10 = inlined_call_operand.vmem [shape: f32[8,512], index: 10, kind: input, shape index: {}]   ;;  %s4532_s11 = inlined_call_operand.hbm [shape: f32[1,512], index: 11, kind: input, shape index: {}]   ;;  %s4533_s12 = inlined_call_operand.vmem [shape: f32[128,32], index: 12, kind: input, shape index: {}]   ;;  %s4534_s13 = inlined_call_operand.hbm [shape: f32[1,32], index: 13, kind: input, shape index: {}]   ;;  %s4535_s14 = inlined_call_operand.hbm [shape: f32[1,32], index: 14, kind: input, shape index: {}]   ;;  %s4536_s15 = inlined_call_operand.hbm [shape: f32[1,32], index: 15, kind: input, shape index: {}]   ;;  %s4537_s16 = inlined_call_operand.hbm [shape: f32[32,128], index: 16, kind: input, shape index: {}]   ;;  %s4538_s17 = inlined_call_operand.hbm [shape: f32[32,128], index: 17, kind: input, shape index: {}]   ;;  %s4539_s18 = inlined_call_operand.hbm [shape: f32[8,128], index: 18, kind: input, shape index: {}]   ;;  %s4540_s19 = inlined_call_operand.hbm [shape: f32[1,128], index: 19, kind: input, shape index: {}]   ;;  %s4541_s20 = inlined_call_operand.hbm [shape: f32[32,32], index: 20, kind: input, shape index: {}]   ;;  %s4542_s21 = inlined_call_operand.hbm [shape: f32[1,32], index: 21, kind: input, shape index: {}]   ;;  %s4543_s22 = inlined_call_operand.vmem [shape: f32[32,4], index: 22, kind: input, shape index: {}]   ;;  %s4544_s23 = inlined_call_operand.hbm [shape: f32[1,4], index: 23, kind: input, shape index: {}]   ;;  %s4545_s24 = inlined_call_operand.hbm [shape: f32[1,4], index: 24, kind: output, shape index: {}]  }
   0x1   :  { %4549 = sst [smem:[#allocation29_spill]] %s4521_s0 }
   0x2   :  { %4550 = sst [smem:[#allocation30_spill]] %s4522_s1 }
   0x3   :  { %4551 = sst [smem:[#allocation31_spill]] %s4523_s2 }
   0x4   :  { %4552 = sst [smem:[#allocation32_spill]] %s4524_s3 }
   0x5   :  { %4553 = sst [smem:[#allocation33_spill]] %s4525_s4 }
   0x6   :  { %4554 = sst [smem:[#allocation34_spill]] %s4526_s5 }
   0x7   :  { %4555 = sst [smem:[#allocation35_spill]] %s4527_s6 }
   0x8   :  { %4556 = sst [smem:[#allocation36_spill]] %s4528_s7 }
   0x9   :  { %4557 = sst [smem:[#allocation37_spill]] %s4529_s8 }
   0xa   :  { %30 = vsyncpa [#allocation4], 0 }
   0xb   :  { %31 = vsyncpa [#allocation7], 0 }
   0xc   :  { %32 = vsyncpa [#allocation10], 0 }
   0xd   :  { %33 = vsyncpa [#allocation13], 0 }
   0xe   :  { %34 = vsyncpa [#allocation16], 0 }
   0xf   :  { %35 = vsyncpa [#allocation19], 0 }
  0x10   :  { %36 = vsyncpa [#allocation5], 0  ;;  %s3770_s5 = smov [#allocation6]   ;;  %s3771_s27 = smov [#allocation9]  }
  0x11   :  { %s77_s26 = sshll.u32 %s3770_s5, 4  ;;  %s97_s28 = sshll.u32 %s3771_s27, 4  ;;  %s78_s26 = int_to_ptr.vmem [resolvable:$true] %s77_s26  ;;  %s98_s28 = int_to_ptr.vmem [resolvable:$true] %s97_s28 }
  0x12   :  { %s3524_s6 = scalar_lea.vmem %s78_s26, 16  ;;  %s3528_s2 = scalar_lea.vmem %s78_s26, 32 }
  0x13   :  { %p3525_p0 = scmp.ne.s32.totalorder %s78_s26, %s3524_s6  ;;  %p3529_p1 = scmp.lt.s32.totalorder %s78_s26, %s78_s26 }
  0x14   :  { %p3530_p2 = scmp.lt.s32.totalorder %s3528_s2, %s3524_s6 }
  0x16   :  { %p3531_p3 = por %p3530_p2, %p3529_p1 }
  0x18   :  { %p3532_p4 = pnand %p3531_p3, %p3525_p0 }
  0x1a   :  { %3535 = shalt.err (!%p3532_p4)
}
  0x1b   :  { %80 = dma.hbm_to_vmem [thread:$0]  %s4534_s13, 16, %s78_s26, [#allocation7]  }
  0x1c   :  { %s3544_s7 = scalar_lea.vmem %s98_s28, 16  ;;  %s3548_s30 = scalar_lea.vmem %s98_s28, 32 }
  0x1d   :  { %p3545_p5 = scmp.ne.s32.totalorder %s98_s28, %s3544_s7  ;;  %p3549_p6 = scmp.lt.s32.totalorder %s98_s28, %s98_s28 }
  0x1e   :  { %p3550_p7 = scmp.lt.s32.totalorder %s3548_s30, %s3544_s7 }
  0x20   :  { %p3551_p8 = por %p3550_p7, %p3549_p6 }
  0x22   :  { %p3552_p9 = pnand %p3551_p8, %p3545_p5 }
  0x24   :  { %3555 = shalt.err (!%p3552_p9)
}
  0x25   :  { %100 = dma.hbm_to_vmem [thread:$0]  %s4536_s15, 16, %s98_s28, [#allocation10]  }
  0x26   :  { %s3772_s8 = smov [#allocation12]   ;;  %s3773_s1 = smov [#allocation15]  }
  0x27   :  { %s118_s4 = sshll.u32 %s3772_s8, 4  ;;  %s141_s5 = sshll.u32 %s3773_s1, 4  ;;  %s119_s4 = int_to_ptr.vmem [resolvable:$true] %s118_s4  ;;  %s142_s5 = int_to_ptr.vmem [resolvable:$true] %s141_s5 }
  0x28   :  { %s3564_s27 = scalar_lea.vmem %s119_s4, 512  ;;  %p3569_p11 = scmp.lt.s32.totalorder %s119_s4, %s119_s4 }
  0x29   :  { %p3565_p10 = scmp.ne.s32.totalorder %s119_s4, %s3564_s27  ;;  %p3570_p12 = scmp.lt.s32.totalorder %s3564_s27, %s3564_s27 }
  0x2b   :  { %p3571_p13 = por %p3570_p12, %p3569_p11 }
  0x2d   :  { %p3572_p0 = pnand %p3571_p13, %p3565_p10 }
  0x2f   :  { %3575 = shalt.err (!%p3572_p0)
}
  0x30   :  { %s3774_s13 = smov 128   ;;  %s3775_s26 = smov 8  }
  0x31   :  { %124 = dma.hbm_to_vmem [thread:$0]  %s4538_s17, 512, %s119_s4, [#allocation13], %s3774_s13, %s3774_s13, %s3775_s26  }
  0x32   :  { %s3584_s28 = scalar_lea.vmem %s142_s5, 16  ;;  %s3588_s2 = scalar_lea.vmem %s142_s5, 32 }
  0x33   :  { %p3585_p1 = scmp.ne.s32.totalorder %s142_s5, %s3584_s28  ;;  %p3589_p2 = scmp.lt.s32.totalorder %s142_s5, %s142_s5 }
  0x34   :  { %p3590_p3 = scmp.lt.s32.totalorder %s3588_s2, %s3584_s28 }
  0x36   :  { %p3591_p4 = por %p3590_p3, %p3589_p2 }
  0x38   :  { %p3592_p5 = pnand %p3591_p4, %p3585_p1 }
  0x3a   :  { %3595 = shalt.err (!%p3592_p5)
}
  0x3b   :  { %144 = dma.hbm_to_vmem [thread:$0]  %s4540_s19, 16, %s142_s5, [#allocation16]  }
  0x3c   :  { %s3776_s7 = smov [#allocation18]   ;;  %s3777_s3 = smov [#allocation3]  }
  0x3d   :  { %s163_s30 = sshll.u32 %s3776_s7, 4  ;;  %s65_s25 = sshll.u32 %s3777_s3, 4  ;;  %s164_s30 = int_to_ptr.vmem [resolvable:$true] %s163_s30  ;;  %s66_s25 = int_to_ptr.vmem [resolvable:$true] %s65_s25 }
  0x3e   :  { %s3604_s8 = scalar_lea.vmem %s164_s30, 16  ;;  %s3608_s17 = scalar_lea.vmem %s164_s30, 32 }
  0x3f   :  { %p3605_p6 = scmp.ne.s32.totalorder %s164_s30, %s3604_s8  ;;  %p3609_p7 = scmp.lt.s32.totalorder %s164_s30, %s164_s30 }
  0x40   :  { %p3610_p8 = scmp.lt.s32.totalorder %s3608_s17, %s3604_s8 }
  0x42   :  { %p3611_p9 = por %p3610_p8, %p3609_p7 }
  0x44   :  { %p3612_p10 = pnand %p3611_p9, %p3605_p6 }
  0x46   :  { %3615 = shalt.err (!%p3612_p10)
}
  0x47   :  { %166 = dma.hbm_to_vmem [thread:$0]  %s4542_s21, 16, %s164_s30, [#allocation19]  }
  0x48   :  { %s3624_s27 = scalar_lea.vmem %s66_s25, 64  ;;  %p3629_p12 = scmp.lt.s32.totalorder %s66_s25, %s66_s25 }
  0x49   :  { %p3625_p11 = scmp.ne.s32.totalorder %s66_s25, %s3624_s27  ;;  %p3630_p13 = scmp.lt.s32.totalorder %s3624_s27, %s3624_s27 }
  0x4b   :  { %p3631_p0 = por %p3630_p13, %p3629_p12 }
  0x4d   :  { %p3632_p1 = pnand %p3631_p0, %p3625_p11 }
  0x4f   :  { %3635 = shalt.err (!%p3632_p1)
}
  0x50   :  { %68 = dma.hbm_to_vmem [thread:$0]  %s4532_s11, 64, %s66_s25, [#allocation4]  }
  0x51   :  { %s3778_s6 = smov [#allocation8]   ;;  %s3779_s28 = smov [#allocation11]  }
  0x52   :  { %s87_s15 = sshll.u32 %s3778_s6, 4  ;;  %s106_s2 = sshll.u32 %s3779_s28, 4  ;;  %s88_s15 = int_to_ptr.vmem [resolvable:$true] %s87_s15  ;;  %s107_s2 = int_to_ptr.vmem [resolvable:$true] %s106_s2 }
  0x53   :  { %s3644_s29 = scalar_lea.vmem %s88_s15, 16  ;;  %s3648_s21 = scalar_lea.vmem %s88_s15, 32 }
  0x54   :  { %p3645_p2 = scmp.ne.s32.totalorder %s88_s15, %s3644_s29  ;;  %p3649_p3 = scmp.lt.s32.totalorder %s88_s15, %s88_s15 }
  0x55   :  { %p3650_p4 = scmp.lt.s32.totalorder %s3648_s21, %s3644_s29 }
  0x57   :  { %p3651_p5 = por %p3650_p4, %p3649_p3 }
  0x59   :  { %p3652_p6 = pnand %p3651_p5, %p3645_p2 }
  0x5b   :  { %3655 = shalt.err (!%p3652_p6)
}
  0x5c   :  { %90 = dma.hbm_to_vmem [thread:$0]  %s4535_s14, 16, %s88_s15, [#allocation7]  }
  0x5d   :  { %s3664_s30 = scalar_lea.vmem %s107_s2, 512  ;;  %p3669_p8 = scmp.lt.s32.totalorder %s107_s2, %s107_s2 }
  0x5e   :  { %p3665_p7 = scmp.ne.s32.totalorder %s107_s2, %s3664_s30  ;;  %p3670_p9 = scmp.lt.s32.totalorder %s3664_s30, %s3664_s30 }
  0x60   :  { %p3671_p10 = por %p3670_p9, %p3669_p8 }
  0x62   :  { %p3672_p11 = pnand %p3671_p10, %p3665_p7 }
  0x64   :  { %3675 = shalt.err (!%p3672_p11)
}
  0x65   :  { %112 = dma.hbm_to_vmem [thread:$0]  %s4537_s16, 512, %s107_s2, [#allocation10], %s3774_s13, %s3774_s13, %s3775_s26  }
  0x66   :  { %s3780_s25 = smov [#allocation14]   ;;  %s3781_s17 = smov [#allocation17]  }
  0x67   :  { %s131_s8 = sshll.u32 %s3780_s25, 4  ;;  %s150_s4 = sshll.u32 %s3781_s17, 4  ;;  %s132_s8 = int_to_ptr.vmem [resolvable:$true] %s131_s8  ;;  %s151_s4 = int_to_ptr.vmem [resolvable:$true] %s150_s4 }
  0x68   :  { %s3684_s14 = scalar_lea.vmem %s132_s8, 128  ;;  %p3689_p13 = scmp.lt.s32.totalorder %s132_s8, %s132_s8 }
  0x69   :  { %p3685_p12 = scmp.ne.s32.totalorder %s132_s8, %s3684_s14  ;;  %p3690_p0 = scmp.lt.s32.totalorder %s3684_s14, %s3684_s14 }
  0x6b   :  { %p3691_p1 = por %p3690_p0, %p3689_p13 }
  0x6d   :  { %p3692_p2 = pnand %p3691_p1, %p3685_p12 }
  0x6f   :  { %3695 = shalt.err (!%p3692_p2)
}
  0x70   :  { %134 = dma.hbm_to_vmem [thread:$0]  %s4539_s18, 128, %s132_s8, [#allocation13]  }
  0x71   :  { %s3704_s19 = scalar_lea.vmem %s151_s4, 512  ;;  %p3709_p4 = scmp.lt.s32.totalorder %s151_s4, %s151_s4 }
  0x72   :  { %p3705_p3 = scmp.ne.s32.totalorder %s151_s4, %s3704_s19  ;;  %p3710_p5 = scmp.lt.s32.totalorder %s3704_s19, %s3704_s19 }
  0x74   :  { %p3711_p6 = por %p3710_p5, %p3709_p4 }
  0x76   :  { %p3712_p7 = pnand %p3711_p6, %p3705_p3 }
  0x78   :  { %3715 = shalt.err (!%p3712_p7)
}
  0x79   :  { %156 = dma.hbm_to_vmem [thread:$0]  %s4541_s20, 512, %s151_s4, [#allocation16], %s3774_s13, %s3774_s13, %s3775_s26  }
  0x7a   :  { %s3782_s6 = smov [#allocation20]  }
  0x7b   :  { %s175_s15 = sshll.u32 %s3782_s6, 4  ;;  %s176_s15 = int_to_ptr.vmem [resolvable:$true] %s175_s15 }
  0x7c   :  { %s3724_s28 = scalar_lea.vmem %s176_s15, 16  ;;  %s3728_s18 = scalar_lea.vmem %s176_s15, 32 }
  0x7d   :  { %p3725_p8 = scmp.ne.s32.totalorder %s176_s15, %s3724_s28  ;;  %p3729_p9 = scmp.lt.s32.totalorder %s176_s15, %s176_s15 }
  0x7e   :  { %p3730_p10 = scmp.lt.s32.totalorder %s3728_s18, %s3724_s28 }
  0x80   :  { %p3731_p11 = por %p3730_p10, %p3729_p9 }
  0x82   :  { %p3732_p12 = pnand %p3731_p11, %p3725_p8 }
  0x84   :  { %3735 = shalt.err (!%p3732_p12)
}
  0x85   :  { %178 = dma.hbm_to_vmem [thread:$0]  %s4544_s23, 16, %s176_s15, [#allocation19]  }
  0x86   :  { %3756 = dma.done.wait [#allocation4], 64  }
  0x87   :  { %3757 = vsyncadd [#allocation4], 4294967232 }
  0x88   :  { %3758 = dma.done.wait [#allocation7], 32  }
  0x89   :  { %3759 = vsyncadd [#allocation7], 4294967264 }
  0x8a   :  { %3760 = dma.done.wait [#allocation10], 528  }
  0x8b   :  { %3761 = vsyncadd [#allocation10], 4294966768 }
  0x8c   :  { %3762 = dma.done.wait [#allocation13], 640  }
  0x8d   :  { %3763 = vsyncadd [#allocation13], 4294966656 }
  0x8e   :  { %3764 = dma.done.wait [#allocation16], 528  }
  0x8f   :  { %3765 = vsyncadd [#allocation16], 4294966768 }
  0x90   :  { %3766 = dma.done.wait [#allocation19], 32  }
  0x91   :  { %3767 = vsyncadd [#allocation19], 4294967264  ;;  %v3783_v0 = vmov 0.0   ;;  %vm3784_vm0 = vmmov 0   ;;  %vm224_vm1 = vcmask 64512   ;;  %s4558_s13 = sld [smem:[#allocation35_spill]] }
  0x92   :  { %3203 = vmatprep.subr.mxu1 %v3783_v0  ;;  %3211 = vmatprep.mubr.msk.f32.mxu1 %vm3784_vm0, %v3783_v0  ;;  %s4559_s0 = sld [smem:[#allocation36_spill]]  ;;  %s3785_s6 = smov 64   ;;  %vm326_vm2 = vcmask 261120   ;;  %vm743_vm4 = vcmask 130048   ;;  %vm3007_vm13 = vcmask 24576  }
  0x93   :  { %s4560_s11 = sld [smem:[#allocation30_spill]]  ;;  %s3786_s15 = smov 32  }
  0x94   :  { %s4561_s5 = sld [smem:[#allocation37_spill]]  ;;  %s3789_s16 = smov [#allocation21]  }
  0x95   :  { %s4566_s4 = sld [smem:[#allocation34_spill]] }
  0x97   :  { %v216_v1 = vld [vmem:[%s4558_s13] sm:$0xff]  ;;  %s4562_s13 = sld [smem:[#allocation32_spill]] }
  0x98   :  { %v3966_v2 = vld [vmem:[%s4559_s0 + $0x18] sm:$0xff]  ;;  %3195 = vmatprep.subr.mxu0 %v216_v1  ;;  %v3978_v5 = vld [vmem:[%s4559_s0 + $0x10] sm:$0xff]  ;;  %v3986_v6 = vld [vmem:[%s4559_s0 + $0x8] sm:$0xff] }
  0x99   :  { %v212_v3 = vld [vmem:[%s4560_s11] sm:$0xff]  ;;  %3204 = vmatpush3.msra.mxu1 %v3966_v2  ;;  %v213_v4 = vld [vmem:[%s4560_s11 + $0x8] sm:$0xff]  ;;  %3196 = vmatpush3.msra.mxu0 %v216_v1  ;;  %v214_v25 = vld [vmem:[%s4560_s11 + $0x10] sm:$0xff] }
  0x9a   :  { %3197 = vmatprep.mubr.msk.f32.mxu0 %vm224_vm1, %v212_v3  ;;  %3205 = vmatprep.subr.mxu1 %v3783_v0  ;;  %v3994_v7 = vld [vmem:[%s4559_s0] sm:$0xff]  ;;  %v215_v26 = vld [vmem:[%s4560_s11 + $0x18] sm:$0xff]  ;;  %s4563_s0 = sld [smem:[#allocation33_spill]] }
  0x9b   :  { %3198 = vmatmul.mubr.msk.f32.vlgmr.msra.gmra.mxu0 %vm224_vm1, %v213_v4  ;;  %3206 = vmatpush3.msra.mxu1 %v3978_v5  ;;  %v4022_v9 = vld [vmem:[%s4561_s5] ss:$0 sm:$0xff]  ;;  %s4564_s11 = sld [smem:[#allocation31_spill]]  ;;  %s3015_s5 = sshll.u32 %s3789_s16, 4  ;;  %s3016_s5 = int_to_ptr.vmem [resolvable:$true] %s3015_s5 }
  0x9c   :  { %3214 = vmatprep.subr.mxu0 %v3783_v0  ;;  %3207 = vmatprep.subr.mxu1 %v3783_v0  ;;  %s3740_s28 = scalar_lea.vmem %s3016_s5, 32  ;;  %p3741_p0 = scmp.lt.s32.totalorder %s3016_s5, %s3016_s5 }
  0x9d   :  { %3215 = vmatpush3.msra.mxu0 %v3966_v2  ;;  %3208 = vmatpush3.msra.mxu1 %v3986_v6 }
  0x9e   :  { %3216 = vmatprep.subr.mxu0 %v3783_v0  ;;  %3209 = vmatprep.subr.mxu1 %v3783_v0 }
  0x9f   :  { %3217 = vmatpush3.msra.mxu0 %v3978_v5  ;;  %3210 = vmatpush3.msra.mxu1 %v3994_v7 }
  0xa0   :  { %3218 = vmatprep.subr.mxu0 %v3783_v0  ;;  %3212 = vmatmul.mubr.f32.vlgmr.msra.gmra.mxu1 %v3783_v0 }
  0xa1   :  { %3219 = vmatpush3.msra.mxu0 %v3986_v6  ;;  %3225 = vmatprep.subr.mxu1 %v3783_v0 }
  0xa2   :  { %3220 = vmatprep.subr.mxu0 %v3783_v0  ;;  %3226 = vmatpush3.msra.mxu1 %v3966_v2 }
  0xa3   :  { %3221 = vmatpush3.msra.mxu0 %v3994_v7  ;;  %3227 = vmatprep.subr.mxu1 %v3783_v0 }
  0xa4   :  { %3233 = vmatprep.mubr.msk.f32.mxu1 %vm3784_vm0, %v3783_v0  ;;  %3228 = vmatpush3.msra.mxu1 %v3978_v5 }
  0xa5   :  { %3236 = vmatprep.subr.mxu0 %v3783_v0  ;;  %3229 = vmatprep.subr.mxu1 %v3783_v0 }
  0xa6   :  { %3230 = vmatpush3.msra.mxu1 %v3986_v6  ;;  %3200 = vmatprep.mubr.msk.f32.mxu0 %vm224_vm1, %v214_v25 }
  0xa7   :  { %3231 = vmatprep.subr.mxu1 %v3783_v0  ;;  %3201 = vmatmul.mubr.msk.f32.gmra.mxu0 %vm224_vm1, %v215_v26 }
  0xa8   :  { %3232 = vmatpush3.msra.mxu1 %v3994_v7  ;;  %3222 = vmatprep.mubr.msk.f32.mxu0 %vm3784_vm0, %v3783_v0 }
  0xa9   :  { %3247 = vmatprep.subr.mxu1 %v3783_v0 }
 0x15b   :  { %v3199_v8 = vpop.f32.mrf.mxu0 }
 0x15c   :  { %v309_v33 = vadd.f32 %v3199_v8, %v4022_v9 }
 0x15d   :  { %v303_v10 = vpop.f32.mrf.mxu0 }
 0x15e   :  { %v304_v11 = vadd.f32 %v4022_v9, %v303_v10 }
 0x160   :  { %v396_v12 = vpop.f32.mrf.mxu1 }
 0x161   :  { %v400_v13 = vadd.f32 %v396_v12, %v304_v11  ;;  %v4070_v11 = vld [vmem:[%s4562_s13] sm:$0xff]  ;;  %v3787_v12 = vmov 0  }
 0x162   :  { %v3213_v14 = vpop.f32.mrf.mxu1  ;;  %3460 = vset.pattern.permute.xlu0 %v3787_v12  ;;  %3461 = vset.pattern.permute.xlu1 %v3787_v12  ;;  %v4282_v12 = vld [vmem:[%s4533_s12 + $0x10] sm:$0xff] }
 0x163   :  { %3462 = vtanh.f32 %v400_v13  ;;  %v3034_v16 = vmul.f32 -1.442695, %v400_v13 }
 0x165   :  { %3464 = vpow2.f32 %v3034_v16 }
 0x167   :  { %v3202_v31 = vpop.f32.mrf.mxu0 }
 0x169   :  { %v313_v32 = vpop.f32.mrf.mxu0 }
 0x16a   :  { %v314_v51 = vadd.f32 %v4022_v9, %v313_v32  ;;  %v924_v32 = vld [vmem:[%s4531_s10 + $0x10] sm:$0xff] }
 0x170   :  { %v3463_v15 = vpop.eup %3462 }
 0x171   :  { %410 = vrot.lane.b32.xlu0 %v3463_v15, %s3785_s6 }
 0x172   :  { %v3465_v17 = vpop.eup %3464 }
 0x173   :  { %v404_v18 = vadd.f32 1.0, %v3465_v17 }
 0x175   :  { %3466 = vrcp.f32 %v404_v18 }
 0x182   :  { %v3467_v19 = vpop.eup %3466 }
 0x183   :  { %v408_v22 = vmul.f32 0.0, %v3467_v19 }
 0x1e3   :  { %v411_v20 = vpop.permute.xlu0 %410 }
 0x1e4   :  { %v413_v21 = vmul.f32 %v3467_v19, %v411_v20  ;;  %v832_v20 = vld [vmem:[%s4563_s0] sm:$0xff] }
 0x1e6   :  { %415 = vrot.lane.b32.xlu0 %v413_v21, %s3786_s15 }
 0x258   :  { %v416_v23 = vpop.permute.xlu0 %415 }
 0x259   :  { %v418_v24 = vadd.f32 %v416_v23, %v408_v22 }
 0x25b   :  { %3468 = vtanh.f32 %v418_v24 }
 0x268   :  { %v3469_v27 = vpop.eup %3468 }
 0x269   :  { %421 = vrot.lane.b32.xlu1 %v3469_v27, %s3785_s6 }
 0x2db   :  { %v422_v28 = vpop.permute.xlu1 %421 }
 0x2dc   :  { %v424_v29 = vmul.f32 %v3467_v19, %v422_v28  ;;  %v727_v19 = vlaneseq  ;;  %v3043_v28 = vld [vmem:[%s4564_s11] ss:$0 sm:$0xff] }
 0x2de   :  { %426 = vrot.lane.b32.xlu1 %v424_v29, %s3786_s15  ;;  %v4081_v22 = vand.u32 127, %v727_v19  ;;  %v4088_v27 = vshrl.u32 %v727_v19, 7  ;;  %v3041_v29 = vld [vmem:[%s4564_s11 + $0x1] ss:$0 sm:$0xff]  ;;  %s4565_s11 = sld [smem:[#allocation29_spill]] }
 0x2e0   :  { %vm740_vm5 = vcmp.eq.s32.totalorder %v4088_v27, %v3043_v28  ;;  %vm733_vm6 = vcmp.eq.s32.totalorder %v4088_v27, %v3041_v29 }
 0x350   :  { %v427_v30 = vpop.permute.xlu1 %426 }
 0x351   :  { %3223 = vmatmul.mubr.msk.f32.vlgmr.msra.gmra.mxu0 %vm326_vm2, %v427_v30  ;;  %v923_v30 = vld [vmem:[%s4531_s10 + $0x8] sm:$0xff] }
 0x352   :  { %3237 = vmatpush3.msra.mxu0 %v3966_v2  ;;  %3244 = vmatprep.mubr.msk.f32.mxu0 %vm3784_vm0, %v3783_v0 }
 0x353   :  { %3238 = vmatprep.subr.mxu0 %v3783_v0 }
 0x354   :  { %3239 = vmatpush3.msra.mxu0 %v3978_v5 }
 0x355   :  { %3240 = vmatprep.subr.mxu0 %v3783_v0 }
 0x356   :  { %3241 = vmatpush3.msra.mxu0 %v3986_v6  ;;  %v319_v6 = vadd.f32 %v3202_v31, %v4022_v9  ;;  %v925_v31 = vld [vmem:[%s4531_s10 + $0x18] sm:$0xff] }
 0x357   :  { %3242 = vmatprep.subr.mxu0 %v3783_v0 }
 0x358   :  { %3243 = vmatpush3.msra.mxu0 %v3994_v7 }
 0x359   :  { %3252 = vmatprep.subr.mxu0 %v3783_v0 }
 0x411   :  { %v496_v34 = vpop.f32.mrf.mxu0 }
 0x412   :  { %v500_v35 = vadd.f32 %v496_v34, %v309_v33  ;;  %v3044_v33 = vsel %vm740_vm5, 1.0, %v3783_v0  ;;  %v921_v34 = vld [vmem:[%s4530_s9 + $0x78] sm:$0xff] }
 0x413   :  { %v3224_v36 = vpop.f32.mrf.mxu0 }
 0x414   :  { %3470 = vtanh.f32 %v500_v35  ;;  %v3036_v38 = vmul.f32 -1.442695, %v500_v35  ;;  %v3042_v35 = vsel %vm733_vm6, 1.0, %v3783_v0  ;;  %v922_v36 = vld [vmem:[%s4531_s10] sm:$0xff] }
 0x416   :  { %3472 = vpow2.f32 %v3036_v38 }
 0x421   :  { %v3471_v37 = vpop.eup %3470 }
 0x422   :  { %510 = vrot.lane.b32.xlu0 %v3471_v37, %s3785_s6  ;;  %v919_v37 = vld [vmem:[%s4530_s9 + $0x68] sm:$0xff] }
 0x423   :  { %v3473_v39 = vpop.eup %3472 }
 0x424   :  { %v504_v40 = vadd.f32 1.0, %v3473_v39  ;;  %v918_v39 = vld [vmem:[%s4530_s9 + $0x60] sm:$0xff] }
 0x426   :  { %3474 = vrcp.f32 %v504_v40  ;;  %v920_v40 = vld [vmem:[%s4530_s9 + $0x70] sm:$0xff] }
 0x433   :  { %v3475_v41 = vpop.eup %3474 }
 0x434   :  { %v508_v44 = vmul.f32 %v3475_v41, %v418_v24 }
 0x494   :  { %v511_v42 = vpop.permute.xlu0 %510 }
 0x495   :  { %v513_v43 = vmul.f32 %v3475_v41, %v511_v42  ;;  %v915_v42 = vld [vmem:[%s4530_s9 + $0x48] sm:$0xff] }
 0x497   :  { %515 = vrot.lane.b32.xlu1 %v513_v43, %s3786_s15  ;;  %v917_v43 = vld [vmem:[%s4530_s9 + $0x58] sm:$0xff] }
 0x509   :  { %v516_v45 = vpop.permute.xlu1 %515 }
 0x50a   :  { %v518_v46 = vadd.f32 %v516_v45, %v508_v44  ;;  %v914_v44 = vld [vmem:[%s4530_s9 + $0x40] sm:$0xff]  ;;  %v916_v45 = vld [vmem:[%s4530_s9 + $0x50] sm:$0xff] }
 0x50c   :  { %3476 = vtanh.f32 %v518_v46 }
 0x519   :  { %v3477_v47 = vpop.eup %3476 }
 0x51a   :  { %521 = vrot.lane.b32.xlu0 %v3477_v47, %s3785_s6  ;;  %v911_v47 = vld [vmem:[%s4530_s9 + $0x28] sm:$0xff] }
 0x58c   :  { %v522_v48 = vpop.permute.xlu0 %521 }
 0x58d   :  { %v524_v49 = vmul.f32 %v3475_v41, %v522_v48  ;;  %v913_v48 = vld [vmem:[%s4530_s9 + $0x38] sm:$0xff] }
 0x58f   :  { %526 = vrot.lane.b32.xlu1 %v524_v49, %s3786_s15  ;;  %v910_v49 = vld [vmem:[%s4530_s9 + $0x20] sm:$0xff] }
 0x601   :  { %v527_v50 = vpop.permute.xlu1 %526 }
 0x602   :  { %3234 = vmatmul.mubr.msk.f32.vlgmr.msra.gmra.mxu1 %vm326_vm2, %v527_v50  ;;  %v912_v50 = vld [vmem:[%s4530_s9 + $0x30] sm:$0xff] }
 0x603   :  { %3249 = vmatprep.mubr.msk.f32.mxu1 %vm3784_vm0, %v3783_v0  ;;  %3248 = vmatpush3.xpose.msk.msra.mxu1 %vm743_vm4, %v3044_v33 }
 0x604   :  { %959 = vmatprep.subr.mxu1 %v923_v30 }
 0x606   :  { %3250 = vmatmul.mubr.msk.f32.vlgmr.msra.gmra.mxu1 %vm743_vm4, %v3042_v35 }
 0x607   :  { %960 = vmatpush1.msra.mxu1 %v922_v36  ;;  %993 = vmatprep.mubr.f32.mxu1 %v3783_v0 }
 0x608   :  { %1100 = vmatprep.subr.mxu1 %v919_v37 }
 0x6c2   :  { %v596_v52 = vpop.f32.mrf.mxu1 }
 0x6c3   :  { %v600_v53 = vadd.f32 %v596_v52, %v314_v51  ;;  %v907_v51 = vld [vmem:[%s4530_s9 + $0x8] sm:$0xff]  ;;  %v909_v52 = vld [vmem:[%s4530_s9 + $0x18] sm:$0xff] }
 0x6c4   :  { %v3235_v54 = vpop.f32.mrf.mxu1 }
 0x6c5   :  { %3478 = vtanh.f32 %v600_v53  ;;  %v3038_v56 = vmul.f32 -1.442695, %v600_v53  ;;  %v906_v53 = vld [vmem:[%s4530_s9] sm:$0xff]  ;;  %v908_v54 = vld [vmem:[%s4530_s9 + $0x10] sm:$0xff] }
 0x6c7   :  { %3480 = vpow2.f32 %v3038_v56 }
 0x6d2   :  { %v3479_v55 = vpop.eup %3478 }
 0x6d3   :  { %610 = vrot.lane.b32.xlu0 %v3479_v55, %s3785_s6 }
 0x6d4   :  { %v3481_v57 = vpop.eup %3480 }
 0x6d5   :  { %v604_v58 = vadd.f32 1.0, %v3481_v57  ;;  %v4176_v57 = vpop.f32.mrf.mxu1 }
 0x6d6   :  { %vm820_vm7 = vcmp.gt.f32.partialorder %v4176_v57, 0.0 }
 0x6d7   :  { %3482 = vrcp.f32 %v604_v58  ;;  %v3251_v58 = vpop.f32.mrf.mxu1 }
 0x6e4   :  { %v3483_v59 = vpop.eup %3482 }
 0x6e5   :  { %v608_v62 = vmul.f32 %v3483_v59, %v518_v46 }
 0x745   :  { %v611_v60 = vpop.permute.xlu0 %610 }
 0x746   :  { %v613_v61 = vmul.f32 %v3483_v59, %v611_v60 }
 0x748   :  { %615 = vrot.lane.b32.xlu1 %v613_v61, %s3786_s15  ;;  %v4192_v61 = vld [vmem:[%s4533_s12 + $0x70] sm:$0xff] }
 0x7ba   :  { %v616_v63 = vpop.permute.xlu1 %615 }
 0x7bb   :  { %v618_v1 = vadd.f32 %v616_v63, %v608_v62  ;;  %v4201_v62 = vld [vmem:[%s4533_s12 + $0x68] sm:$0xff]  ;;  %v4210_v63 = vld [vmem:[%s4533_s12 + $0x60] sm:$0xff] }
 0x7bd   :  { %3484 = vtanh.f32 %v618_v1 }
 0x7ca   :  { %v3485_v2 = vpop.eup %3484 }
 0x7cb   :  { %621 = vrot.lane.b32.xlu0 %v3485_v2, %s3785_s6  ;;  %v4224_v2 = vld [vmem:[%s4533_s12 + $0x50] sm:$0xff] }
 0x7cf   :  { %827 = vperm.xlu0 %3460, %v4070_v11  }
 0x83d   :  { %v622_v3 = vpop.permute.xlu0 %621 }
 0x83e   :  { %v624_v4 = vmul.f32 %v3483_v59, %v622_v3  ;;  %v4181_v59 = vld [vmem:[%s4533_s12 + $0x78] sm:$0xff]  ;;  %v4231_v3 = vld [vmem:[%s4533_s12 + $0x48] sm:$0xff] }
 0x840   :  { %626 = vrot.lane.b32.xlu1 %v624_v4, %s3786_s15  ;;  %v4238_v4 = vld [vmem:[%s4533_s12 + $0x40] sm:$0xff] }
 0x84a   :  { %v828_v21 = vpop.permute.xlu0 %827 }
 0x84b   :  { %vm829_vm3 = vcmp.eq.s32.totalorder %v4081_v22, %v828_v21  ;;  %v1218_v21 = vld [vmem:[#allocation3] sm:$0xf] }
 0x84c   :  { %v3048_v23 = vsel %vm829_vm3, 1.0, %v3783_v0 }
 0x8b2   :  { %v627_v5 = vpop.permute.xlu1 %626 }
 0x8b3   :  { %3245 = vmatmul.mubr.msk.f32.vlgmr.msra.gmra.mxu0 %vm326_vm2, %v627_v5  ;;  %v4245_v5 = vld [vmem:[%s4533_s12 + $0x38] sm:$0xff] }
 0x8b4   :  { %3254 = vmatprep.mubr.msk.f32.mxu0 %vm3784_vm0, %v3783_v0  ;;  %3253 = vmatpush3.msra.mxu0 %v832_v20 }
 0x8b5   :  { %1030 = vmatprep.subr.mxu0 %v925_v31 }
 0x8b7   :  { %3255 = vmatmul.mubr.msk.f32.vlgmr.msra.gmra.mxu0 %vm224_vm1, %v3048_v23  ;;  %v1222_v23 = vsub.s32 0, %v4088_v27 }
 0x8b8   :  { %1064 = vmatprep.mubr.f32.mxu0 %v3783_v0  ;;  %1031 = vmatpush1.msra.mxu0 %v924_v32 }
 0x8b9   :  { %1171 = vmatprep.subr.mxu0 %v921_v34  ;;  %v1223_v34 = vrot.slane %v1218_v21, %v1222_v23 }
 0x973   :  { %v696_v7 = vpop.f32.mrf.mxu0 }
 0x974   :  { %v700_v8 = vadd.f32 %v696_v7, %v319_v6  ;;  %v4252_v6 = vld [vmem:[%s4533_s12 + $0x30] sm:$0xff]  ;;  %v4259_v7 = vld [vmem:[%s4533_s12 + $0x28] sm:$0xff] }
 0x975   :  { %v3246_v10 = vpop.f32.mrf.mxu0 }
 0x976   :  { %3486 = vtanh.f32 %v700_v8  ;;  %v3040_v14 = vmul.f32 -1.442695, %v700_v8  ;;  %v4266_v8 = vld [vmem:[%s4533_s12 + $0x20] sm:$0xff]  ;;  %v4275_v10 = vld [vmem:[%s4533_s12 + $0x18] sm:$0xff] }
 0x977   :  { %v4128_v41 = vpop.f32.mrf.mxu0 }
 0x978   :  { %3488 = vpow2.f32 %v3040_v14  ;;  %3050 = vmatmul.mubr.msk.f32.vlgmr.msra.gmra.mxu1 %vm224_vm1, %v4128_v41  ;;  %3051 = vmatmul.mubr.msk.f32.vlgmr.msra.gmra.mxu0 %vm224_vm1, %v4128_v41  ;;  %v4296_v14 = vld [vmem:[%s4533_s12] sm:$0xff] }
 0x979   :  { %v3256_v46 = vpop.f32.mrf.mxu0  ;;  %1101 = vmatpush1.msra.mxu1 %v918_v39  ;;  %1172 = vmatpush1.msra.mxu0 %v920_v40 }
 0x97a   :  { %1102 = vmatprep.subr.mxu1 %v915_v42  ;;  %1173 = vmatprep.subr.mxu0 %v917_v43  ;;  %v4325_v42 = vsel %vm820_vm7, 1.0, %v3783_v0 }
 0x97b   :  { %1103 = vmatpush1.msra.mxu1 %v914_v44  ;;  %1174 = vmatpush1.msra.mxu0 %v916_v45  ;;  %vm1415_vm8 = vcmp.gt.f32.partialorder %v4325_v42, 0.0 }
 0x97c   :  { %1104 = vmatprep.subr.mxu1 %v911_v47  ;;  %1175 = vmatprep.subr.mxu0 %v913_v48 }
 0x97d   :  { %1105 = vmatpush1.msra.mxu1 %v910_v49  ;;  %1176 = vmatpush1.msra.mxu0 %v912_v50 }
 0x97e   :  { %1106 = vmatprep.subr.mxu1 %v907_v51  ;;  %1177 = vmatprep.subr.mxu0 %v909_v52 }
 0x97f   :  { %1140 = vmatprep.mubr.f32.mxu1 %v3783_v0  ;;  %1211 = vmatprep.mubr.f32.mxu0 %v3783_v0 }
 0x980   :  { %1107 = vmatpush1.msra.mxu1 %v906_v53  ;;  %1178 = vmatpush1.msra.mxu0 %v908_v54 }
 0x981   :  { %3257 = vmatprep.subr.mxu1 %v3783_v0  ;;  %3292 = vmatprep.subr.mxu0 %v3783_v0 }
 0x983   :  { %v3487_v13 = vpop.eup %3486 }
 0x984   :  { %710 = vrot.lane.b32.xlu1 %v3487_v13, %s3785_s6  ;;  %v4289_v13 = vld [vmem:[%s4533_s12 + $0x8] sm:$0xff] }
 0x985   :  { %v3489_v9 = vpop.eup %3488 }
 0x986   :  { %v704_v15 = vadd.f32 1.0, %v3489_v9 }
 0x988   :  { %3490 = vrcp.f32 %v704_v15 }
 0x995   :  { %v4074_v16 = vpop.eup %3490 }
 0x996   :  { %v708_v24 = vmul.f32 %v4074_v16, %v618_v1  ;;  %v4217_v1 = vld [vmem:[%s4533_s12 + $0x58] sm:$0xff]  ;;  %s3788_s12 = smov 96  }
 0x9f6   :  { %v711_v17 = vpop.permute.xlu1 %710 }
 0x9f7   :  { %v713_v18 = vmul.f32 %v4074_v16, %v711_v17  ;;  %v1234_v17 = vsub.s32 3, %v4088_v27 }
 0x9f9   :  { %715 = vrot.lane.b32.xlu1 %v713_v18, %s3786_s15  ;;  %v1235_v28 = vrot.slane %v1218_v21, %v1234_v17 }
 0xa38   :  { %v995_v9 = vpop.f32.mrf.mxu1  ;;  %v1066_v15 = vpop.f32.mrf.mxu0 }
 0xa3a   :  { %v997_v18 = vpop.f32.mrf.mxu1  ;;  %v1068_v19 = vpop.f32.mrf.mxu0 }
 0xa6b   :  { %v716_v25 = vpop.permute.xlu1 %715 }
 0xa6c   :  { %v718_v26 = vadd.f32 %v716_v25, %v708_v24  ;;  %v1230_v25 = vsub.s32 2, %v4088_v27 }
 0xa6e   :  { %3492 = vtanh.f32 %v718_v26  ;;  %v1231_v36 = vrot.slane %v1218_v21, %v1230_v25 }
 0xa7b   :  { %v3493_v38 = vpop.eup %3492 }
 0xa7c   :  { %721 = vrot.lane.b32.xlu0 %v3493_v38, %s3785_s6 }
 0xaee   :  { %v722_v55 = vpop.permute.xlu0 %721 }
 0xaef   :  { %v724_v56 = vmul.f32 %v4074_v16, %v722_v55  ;;  %v1226_v16 = vsub.s32 1, %v4088_v27 }
 0xaf1   :  { %1072 = vrot.lane.b32.xlu1 %v724_v56, %s3786_s15  ;;  %v1227_v26 = vrot.slane %v1218_v21, %v1226_v16 }
 0xb63   :  { %v4183_v60 = vpop.permute.xlu1 %1072 }
 0xb64   :  { %3052 = vmatmul.mubr.msk.f32.vlgmr.msra.gmra.mxu1 %vm326_vm2, %v4183_v60  ;;  %3053 = vmatmul.mubr.msk.f32.vlgmr.msra.gmra.mxu0 %vm326_vm2, %v4183_v60 }
 0xb65   :  { %3258 = vmatpush3.msra.mxu1 %v4181_v59  ;;  %3289 = vmatprep.mubr.msk.f32.mxu1 %vm3784_vm0, %v3783_v0 }
 0xb66   :  { %3259 = vmatprep.subr.mxu1 %v3783_v0  ;;  %3294 = vmatprep.mubr.msk.f32.mxu0 %vm3784_vm0, %v3783_v0 }
 0xb67   :  { %3260 = vmatpush3.msra.mxu1 %v4192_v61 }
 0xb68   :  { %3261 = vmatprep.subr.mxu1 %v3783_v0 }
 0xb69   :  { %3262 = vmatpush3.msra.mxu1 %v4201_v62 }
 0xb6a   :  { %3263 = vmatprep.subr.mxu1 %v3783_v0 }
 0xb6b   :  { %3264 = vmatpush3.msra.mxu1 %v4210_v63 }
 0xb6c   :  { %3265 = vmatprep.subr.mxu1 %v3783_v0 }
 0xb6d   :  { %3266 = vmatpush3.msra.mxu1 %v4217_v1 }
 0xb6e   :  { %3267 = vmatprep.subr.mxu1 %v3783_v0 }
 0xb6f   :  { %3268 = vmatpush3.msra.mxu1 %v4224_v2 }
 0xb70   :  { %3269 = vmatprep.subr.mxu1 %v3783_v0 }
 0xb71   :  { %3270 = vmatpush3.msra.mxu1 %v4231_v3 }
 0xb72   :  { %3271 = vmatprep.subr.mxu1 %v3783_v0 }
 0xb73   :  { %3272 = vmatpush3.msra.mxu1 %v4238_v4 }
 0xb74   :  { %3273 = vmatprep.subr.mxu1 %v3783_v0 }
 0xb75   :  { %3274 = vmatpush3.msra.mxu1 %v4245_v5 }
 0xb76   :  { %3275 = vmatprep.subr.mxu1 %v3783_v0 }
 0xb77   :  { %3276 = vmatpush3.msra.mxu1 %v4252_v6 }
 0xb78   :  { %3277 = vmatprep.subr.mxu1 %v3783_v0 }
 0xb79   :  { %3278 = vmatpush3.msra.mxu1 %v4259_v7 }
 0xb7a   :  { %3279 = vmatprep.subr.mxu1 %v3783_v0 }
 0xb7b   :  { %3280 = vmatpush3.msra.mxu1 %v4266_v8 }
 0xb7c   :  { %3281 = vmatprep.subr.mxu1 %v3783_v0 }
 0xb7d   :  { %3282 = vmatpush3.msra.mxu1 %v4275_v10 }
 0xb7e   :  { %3283 = vmatprep.subr.mxu1 %v3783_v0 }
 0xb7f   :  { %3284 = vmatpush3.msra.mxu1 %v4282_v12 }
 0xb80   :  { %3285 = vmatprep.subr.mxu1 %v3783_v0 }
 0xb81   :  { %3286 = vmatpush3.msra.mxu1 %v4289_v13 }
 0xb82   :  { %3287 = vmatprep.subr.mxu1 %v3783_v0 }
 0xb83   :  { %3288 = vmatpush3.msra.mxu1 %v4296_v14 }
 0xb84   :  { %3334 = vmatprep.subr.mxu1 %v3783_v0 }
 0xc24   :  { %v1142_v20 = vpop.f32.mrf.mxu1  ;;  %v1213_v24 = vpop.f32.mrf.mxu0 }
 0xc25   :  { %v1143_v33 = vadd.f32 %v1142_v20, %v995_v9  ;;  %v1214_v35 = vadd.f32 %v1213_v24, %v1066_v15 }
 0xc26   :  { %v1144_v29 = vpop.f32.mrf.mxu1  ;;  %v1215_v30 = vpop.f32.mrf.mxu0 }
 0xc27   :  { %v1145_v31 = vadd.f32 %v1144_v29, %v997_v18  ;;  %v1216_v32 = vadd.f32 %v1215_v30, %v1068_v19  ;;  %v4308_v39 = vadd.f32 %v1223_v34, %v1143_v33  ;;  %v4313_v27 = vadd.f32 %v1231_v36, %v1214_v35 }
 0xc29   :  { %v4304_v37 = vadd.f32 %v1227_v26, %v1145_v31  ;;  %v1243_v38 = vadd.f32 %v1235_v28, %v1216_v32 }
 0xc2b   :  { %3290 = vmatmul.mubr.f32.vlgmr.msra.gmra.mxu1 %v1243_v38  ;;  %3293 = vmatpush3.xpose.msk.msra.mxu0 %vm326_vm2, %v4304_v37 }
 0xc2c   :  { %3297 = vmatprep.subr.mxu0 %v3783_v0  ;;  %3336 = vmatprep.mubr.msk.f32.mxu1 %vm3784_vm0, %v3783_v0 }
 0xc2e   :  { %3295 = vmatmul.mubr.msk.f32.vlgmr.msra.gmra.mxu0 %vm326_vm2, %v4308_v39 }
 0xc2f   :  { %3298 = vmatpush3.msra.mxu0 %v4313_v27  ;;  %3299 = vmatprep.mubr.msk.f32.mxu0 %vm3784_vm0, %v3783_v0 }
 0xc30   :  { %3302 = vmatprep.subr.mxu0 %v3783_v0 }
 0xceb   :  { %v4322_v40 = vpop.f32.mrf.mxu1 }
 0xced   :  { %v3291_v43 = vpop.f32.mrf.mxu1 }
 0xcee   :  { %v1410_v44 = vpop.f32.mrf.mxu0 }
 0xcef   :  { %v1414_v45 = vmul.f32 0.17677669, %v1410_v44 }
 0xcf0   :  { %v3296_v46 = vpop.f32.mrf.mxu0 }
 0xcf1   :  { %v1416_v47 = vsel %vm1415_vm8, %v1414_v45, -1e+30 }
 0xcf2   :  { %v1417_v48 = vsel %vm224_vm1, %v1416_v47, -inf }
 0xcf3   :  { %1418 = vmax.xlane.f32.xlu0 %v1417_v48 }
 0xd09   :  { %1579 = vrot.lane.b32.xlu0 %v4304_v37, %s3788_s12 }
 0xd0d   :  { %1823 = vrot.lane.b32.xlu0 %v4304_v37, %s3785_s6 }
 0xd7c   :  { %v1419_v49 = vpop.xlane.xlu0 %1418 }
 0xd7d   :  { %v1420_v50 = vsub.f32 %v1416_v47, %v1419_v49 }
 0xd7f   :  { %v1421_v51 = vmul.f32 1.442695, %v1420_v50 }
 0xd80   :  { %v1580_v52 = vpop.permute.xlu0 %1579 }
 0xd81   :  { %3494 = vpow2.f32 %v1421_v51 }
 0xd84   :  { %v1824_v53 = vpop.permute.xlu0 %1823 }
 0xd85   :  { %3335 = vmatpush3.xpose.msk.msra.mxu1 %vm326_vm2, %v1824_v53 }
 0xd86   :  { %3344 = vmatprep.subr.mxu1 %v3783_v0 }
 0xd8e   :  { %v3495_v54 = vpop.eup %3494 }
 0xd8f   :  { %v1423_v55 = vmul.f32 %v3495_v54, %v4325_v42 }
 0xd91   :  { %v1424_v56 = vsel %vm224_vm1, %v1423_v55, 0.0 }
 0xd92   :  { %1425 = vadd.xlane.f32.xlu1 %v1424_v56 }
 0xda3   :  { %1577 = vrot.lane.b32.xlu1 %v4308_v39, %s3788_s12 }
 0xda7   :  { %1821 = vrot.lane.b32.xlu1 %v4308_v39, %s3785_s6 }
 0xe1b   :  { %v1426_v57 = vpop.xlane.xlu1 %1425 }
 0xe1c   :  { %v1427_v58 = vmax.f32 %v1426_v57, 1e-30 }
 0xe1e   :  { %3496 = vrcp.f32 %v1427_v58 }
 0xe1f   :  { %v1578_v9 = vpop.permute.xlu1 %1577 }
 0xe23   :  { %v1822_v15 = vpop.permute.xlu1 %1821 }
 0xe24   :  { %3337 = vmatmul.mubr.msk.f32.vlgmr.msra.gmra.mxu1 %vm326_vm2, %v1822_v15 }
 0xe25   :  { %3345 = vmatpush3.msra.mxu1 %v4217_v1  ;;  %3352 = vmatprep.mubr.msk.f32.mxu1 %vm3784_vm0, %v3783_v0 }
 0xe26   :  { %3346 = vmatprep.subr.mxu1 %v3783_v0 }
 0xe27   :  { %3347 = vmatpush3.msra.mxu1 %v4224_v2 }
 0xe28   :  { %3348 = vmatprep.subr.mxu1 %v3783_v0 }
 0xe29   :  { %3349 = vmatpush3.msra.mxu1 %v4231_v3 }
 0xe2a   :  { %3350 = vmatprep.subr.mxu1 %v3783_v0 }
 0xe2b   :  { %v3497_v16 = vpop.eup %3496  ;;  %3351 = vmatpush3.msra.mxu1 %v4238_v4 }
 0xe2c   :  { %v1429_v17 = vmul.f32 %v3497_v16, %v1423_v55  ;;  %3365 = vmatprep.subr.mxu1 %v3783_v0 }
 0xe2e   :  { %3300 = vmatmul.mubr.msk.f32.vlgmr.msra.gmra.mxu0 %vm224_vm1, %v1429_v17 }
 0xe2f   :  { %3303 = vmatpush3.msra.mxu0 %v4275_v10  ;;  %3310 = vmatprep.mubr.msk.f32.mxu0 %vm3784_vm0, %v3783_v0  ;;  %v3054_v10 = vld [vmem:[#allocation6] ss:$0 sm:$0xff] }
 0xe30   :  { %3304 = vmatprep.subr.mxu0 %v3783_v0 }
 0xe31   :  { %3305 = vmatpush3.msra.mxu0 %v4282_v12  ;;  %v1337_v12 = vadd.f32 %v3054_v10, %v4322_v40 }
 0xe32   :  { %3306 = vmatprep.subr.mxu0 %v3783_v0 }
 0xe33   :  { %3307 = vmatpush3.msra.mxu0 %v4289_v13 }
 0xe34   :  { %3308 = vmatprep.subr.mxu0 %v3783_v0 }
 0xe35   :  { %3309 = vmatpush3.msra.mxu0 %v4296_v14 }
 0xe36   :  { %3313 = vmatprep.subr.mxu0 %v3783_v0 }
 0xee4   :  { %v1895_v1 = vpop.f32.mrf.mxu1 }
 0xee5   :  { %v1899_v31 = vmul.f32 0.17677669, %v1895_v1 }
 0xee6   :  { %v3338_v2 = vpop.f32.mrf.mxu1 }
 0xee7   :  { %v1900_v34 = vsel %vm1415_vm8, %v1899_v31, -1e+30  ;;  %v2351_v31 = vld [vmem:[#allocation11 + $0x18] sm:$0xff] }
 0xee8   :  { %v1901_v35 = vsel %vm224_vm1, %v1900_v34, -inf }
 0xeee   :  { %v1499_v3 = vpop.f32.mrf.mxu0 }
 0xeef   :  { %3311 = vmatmul.mubr.msk.f32.vlgmr.msra.gmra.mxu0 %vm326_vm2, %v1499_v3 }
 0xef0   :  { %3314 = vmatpush3.xpose.msk.msra.mxu0 %vm326_vm2, %v1580_v52  ;;  %v3301_v4 = vpop.f32.mrf.mxu0  ;;  %3315 = vmatprep.mubr.msk.f32.mxu0 %vm3784_vm0, %v3783_v0 }
 0xef1   :  { %3318 = vmatprep.subr.mxu0 %v3783_v0 }
 0xef3   :  { %3316 = vmatmul.mubr.msk.f32.vlgmr.msra.gmra.mxu0 %vm326_vm2, %v1578_v9 }
 0xef4   :  { %3320 = vmatprep.mubr.msk.f32.mxu0 %vm3784_vm0, %v3783_v0 }
 0xfaf   :  { %v1572_v13 = vpop.f32.mrf.mxu0 }
 0xfb0   :  { %v4374_v14 = vadd.f32 %v1572_v13, %v1337_v12 }
 0xfb1   :  { %v3312_v18 = vpop.f32.mrf.mxu0 }
 0xfb3   :  { %v1651_v19 = vpop.f32.mrf.mxu0 }
 0xfb4   :  { %v1655_v20 = vmul.f32 0.17677669, %v1651_v19  ;;  %v2355_v19 = vld [vmem:[#allocation12 + $0x18] sm:$0xff] }
 0xfb5   :  { %v3317_v21 = vpop.f32.mrf.mxu0 }
 0xfb6   :  { %v1656_v23 = vsel %vm1415_vm8, %v1655_v20, -1e+30  ;;  %v2354_v20 = vld [vmem:[#allocation12 + $0x10] sm:$0xff]  ;;  %v2353_v21 = vld [vmem:[#allocation12 + $0x8] sm:$0xff] }
 0xfb7   :  { %v1657_v24 = vsel %vm224_vm1, %v1656_v23, -inf }
 0xfb8   :  { %1658 = vmax.xlane.f32.xlu0 %v1657_v24  ;;  %v2499_v24 = vld [vmem:[#allocation14] sm:$0xff] }
 0xfce   :  { %1671 = vrot.lane.b32.xlu0 %v4313_v27, %s3788_s12 }
 0xfd2   :  { %2066 = vrot.lane.b32.xlu0 %v4304_v37, %s3786_s15 }
 0xfd6   :  { %2064 = vrot.lane.b32.xlu0 %v4308_v39, %s3786_s15 }
0x1041   :  { %v1659_v25 = vpop.xlane.xlu0 %1658 }
0x1042   :  { %v1660_v26 = vsub.f32 %v1656_v23, %v1659_v25  ;;  %v2352_v23 = vld [vmem:[#allocation12] sm:$0xff] }
0x1044   :  { %v1661_v28 = vmul.f32 1.442695, %v1660_v26 }
0x1045   :  { %v1672_v29 = vpop.permute.xlu0 %1671 }
0x1046   :  { %3498 = vpow2.f32 %v1661_v28  ;;  %3319 = vmatpush3.msra.mxu0 %v1672_v29 }
0x1047   :  { %3323 = vmatprep.subr.mxu0 %v3783_v0 }
0x1053   :  { %v3499_v30 = vpop.eup %3498 }
0x1054   :  { %v1663_v32 = vmul.f32 %v3499_v30, %v4325_v42 }
0x1056   :  { %v1664_v33 = vsel %vm224_vm1, %v1663_v32, 0.0 }
0x1057   :  { %1665 = vadd.xlane.f32.xlu1 %v1664_v33  ;;  %v2348_v33 = vld [vmem:[#allocation11] sm:$0xff] }
0x105b   :  { %1902 = vmax.xlane.f32.xlu1 %v1901_v35 }
0x10e0   :  { %v1666_v36 = vpop.xlane.xlu1 %1665 }
0x10e1   :  { %v1667_v37 = vmax.f32 %v1666_v36, 1e-30 }
0x10e3   :  { %3500 = vrcp.f32 %v1667_v37 }
0x10e4   :  { %v1903_v38 = vpop.xlane.xlu1 %1902 }
0x10e5   :  { %v1904_v39 = vsub.f32 %v1900_v34, %v1903_v38 }
0x10e7   :  { %v1905_v40 = vmul.f32 1.442695, %v1904_v39 }
0x10e9   :  { %3502 = vpow2.f32 %v1905_v40 }
0x10f0   :  { %v3501_v43 = vpop.eup %3500 }
0x10f1   :  { %v1669_v44 = vmul.f32 %v3501_v43, %v1663_v32  ;;  %v2350_v32 = vld [vmem:[#allocation11 + $0x10] sm:$0xff] }
0x10f3   :  { %3321 = vmatmul.mubr.msk.f32.vlgmr.msra.gmra.mxu0 %vm224_vm1, %v1669_v44 }
0x10f4   :  { %3324 = vmatpush3.msra.mxu0 %v4245_v5  ;;  %3331 = vmatprep.mubr.msk.f32.mxu0 %vm3784_vm0, %v3783_v0 }
0x10f5   :  { %3325 = vmatprep.subr.mxu0 %v3783_v0 }
0x10f6   :  { %v3503_v45 = vpop.eup %3502  ;;  %3326 = vmatpush3.msra.mxu0 %v4252_v6 }
0x10f7   :  { %v1907_v46 = vmul.f32 %v3503_v45, %v4325_v42  ;;  %3327 = vmatprep.subr.mxu0 %v3783_v0 }
0x10f8   :  { %3328 = vmatpush3.msra.mxu0 %v4259_v7  ;;  %v2067_v7 = vpop.permute.xlu0 %2066 }
0x10f9   :  { %v1908_v47 = vsel %vm224_vm1, %v1907_v46, 0.0  ;;  %3329 = vmatprep.subr.mxu0 %v3783_v0 }
0x10fa   :  { %1909 = vadd.xlane.f32.xlu1 %v1908_v47  ;;  %3330 = vmatpush3.msra.mxu0 %v4266_v8 }
0x10fb   :  { %3339 = vmatprep.subr.mxu0 %v3783_v0 }
0x10fc   :  { %v2065_v52 = vpop.permute.xlu0 %2064 }
0x110b   :  { %1914 = vrot.lane.b32.xlu1 %v4313_v27, %s3785_s6 }
0x1183   :  { %v1910_v5 = vpop.xlane.xlu1 %1909 }
0x1184   :  { %v1911_v6 = vmax.f32 %v1910_v5, 1e-30 }
0x1186   :  { %3504 = vrcp.f32 %v1911_v6 }
0x1187   :  { %v1915_v50 = vpop.permute.xlu1 %1914 }
0x1193   :  { %v3505_v48 = vpop.eup %3504 }
0x1194   :  { %v1913_v8 = vmul.f32 %v3505_v48, %v1907_v46 }
0x11b3   :  { %v1743_v49 = vpop.f32.mrf.mxu0 }
0x11b4   :  { %3332 = vmatmul.mubr.msk.f32.vlgmr.msra.gmra.mxu0 %vm326_vm2, %v1743_v49 }
0x11b5   :  { %3340 = vmatpush3.msra.mxu0 %v1915_v50  ;;  %v3322_v51 = vpop.f32.mrf.mxu0  ;;  %3341 = vmatprep.mubr.msk.f32.mxu0 %vm3784_vm0, %v3783_v0 }
0x11b6   :  { %3355 = vmatprep.subr.mxu0 %v3783_v0 }
0x11b8   :  { %3342 = vmatmul.mubr.msk.f32.vlgmr.msra.gmra.mxu0 %vm224_vm1, %v1913_v8 }
0x11b9   :  { %3356 = vmatpush3.xpose.msk.msra.mxu0 %vm326_vm2, %v2067_v7  ;;  %3357 = vmatprep.mubr.msk.f32.mxu0 %vm3784_vm0, %v3783_v0 }
0x11ba   :  { %3360 = vmatprep.subr.mxu0 %v3783_v0 }
0x11bc   :  { %3358 = vmatmul.mubr.msk.f32.vlgmr.msra.gmra.mxu0 %vm326_vm2, %v2065_v52 }
0x11bd   :  { %3362 = vmatprep.mubr.msk.f32.mxu0 %vm3784_vm0, %v3783_v0 }
0x1274   :  { %v1816_v53 = vpop.f32.mrf.mxu0 }
0x1275   :  { %v1820_v54 = vadd.f32 %v1816_v53, %v4374_v14 }
0x1276   :  { %v3333_v55 = vpop.f32.mrf.mxu0 }
0x1277   :  { %v3071_v55 = vld [vmem:[#allocation8] ss:$0 sm:$0xff] }
0x1278   :  { %v1986_v56 = vpop.f32.mrf.mxu0 }
0x1279   :  { %3353 = vmatmul.mubr.msk.f32.vlgmr.msra.gmra.mxu1 %vm326_vm2, %v1986_v56 }
0x127a   :  { %v3343_v57 = vpop.f32.mrf.mxu0  ;;  %3366 = vmatpush3.msra.mxu1 %v4181_v59  ;;  %3373 = vmatprep.mubr.msk.f32.mxu1 %vm3784_vm0, %v3783_v0 }
0x127b   :  { %3367 = vmatprep.subr.mxu1 %v3783_v0  ;;  %v3072_v57 = vld [vmem:[#allocation9] ss:$0 sm:$0xff] }
0x127c   :  { %v2138_v58 = vpop.f32.mrf.mxu0  ;;  %3368 = vmatpush3.msra.mxu1 %v4192_v61 }
0x127d   :  { %v2142_v9 = vmul.f32 0.17677669, %v2138_v58  ;;  %3369 = vmatprep.subr.mxu1 %v3783_v0 }
0x127e   :  { %v3359_v15 = vpop.f32.mrf.mxu0  ;;  %3370 = vmatpush3.msra.mxu1 %v4201_v62 }
0x127f   :  { %v2143_v16 = vsel %vm1415_vm8, %v2142_v9, -1e+30  ;;  %3371 = vmatprep.subr.mxu1 %v3783_v0 }
0x1280   :  { %v2144_v59 = vsel %vm224_vm1, %v2143_v16, -inf  ;;  %3372 = vmatpush3.msra.mxu1 %v4210_v63 }
0x1281   :  { %2145 = vmax.xlane.f32.xlu0 %v2144_v59  ;;  %3387 = vmatprep.subr.mxu1 %v3783_v0 }
0x1297   :  { %2157 = vrot.lane.b32.xlu0 %v4313_v27, %s3786_s15 }
0x130a   :  { %v2146_v61 = vpop.xlane.xlu0 %2145 }
0x130b   :  { %v2147_v17 = vsub.f32 %v2143_v16, %v2146_v61 }
0x130d   :  { %v2148_v1 = vmul.f32 1.442695, %v2147_v17  ;;  %v3076_v17 = vld [vmem:[#allocation15] ss:$0 sm:$0xff] }
0x130e   :  { %v2158_v2 = vpop.permute.xlu0 %2157 }
0x130f   :  { %3506 = vpow2.f32 %v2148_v1  ;;  %3361 = vmatpush3.msra.mxu0 %v2158_v2 }
0x1310   :  { %3376 = vmatprep.subr.mxu0 %v3783_v0 }
0x131c   :  { %v3507_v62 = vpop.eup %3506 }
0x131d   :  { %v2150_v3 = vmul.f32 %v3507_v62, %v4325_v42 }
0x131f   :  { %v2151_v4 = vsel %vm224_vm1, %v2150_v3, 0.0 }
0x1320   :  { %2152 = vadd.xlane.f32.xlu1 %v2151_v4 }
0x1339   :  { %v2059_v63 = vpop.f32.mrf.mxu1 }
0x133a   :  { %v2063_v10 = vadd.f32 %v2059_v63, %v1820_v54 }
0x133b   :  { %v3354_v12 = vpop.f32.mrf.mxu1 }
0x13a9   :  { %v2153_v13 = vpop.xlane.xlu1 %2152 }
0x13aa   :  { %v2154_v14 = vmax.f32 %v2153_v13, 1e-30 }
0x13ac   :  { %3508 = vrcp.f32 %v2154_v14 }
0x13b9   :  { %v3509_v27 = vpop.eup %3508 }
0x13ba   :  { %v2156_v18 = vmul.f32 %v3509_v27, %v2150_v3 }
0x13bc   :  { %3363 = vmatmul.mubr.msk.f32.vlgmr.msra.gmra.mxu0 %vm224_vm1, %v2156_v18 }
0x13bd   :  { %3377 = vmatpush3.msra.mxu0 %v2355_v19  ;;  %3384 = vmatprep.mubr.msk.f32.mxu0 %vm3784_vm0, %v3783_v0 }
0x13be   :  { %3378 = vmatprep.subr.mxu0 %v3783_v0 }
0x13bf   :  { %3379 = vmatpush3.msra.mxu0 %v2354_v20 }
0x13c0   :  { %3380 = vmatprep.subr.mxu0 %v3783_v0 }
0x13c1   :  { %3381 = vmatpush3.msra.mxu0 %v2353_v21 }
0x13c2   :  { %3382 = vmatprep.subr.mxu0 %v3783_v0 }
0x13c3   :  { %3383 = vmatpush3.msra.mxu0 %v2352_v23 }
0x13c4   :  { %3385 = vmatmul.mubr.msk.f32.vlgmr.msra.gmra.mxu0 %vm326_vm2, %v4183_v60  ;;  %3398 = vmatprep.subr.mxu0 %v3783_v0 }
0x13c5   :  { %3399 = vmatpush3.msra.mxu0 %v2499_v24  ;;  %3400 = vmatprep.mubr.msk.f32.mxu0 %vm3784_vm0, %v3783_v0  ;;  %v2751_v24 = vstv %s4565_s11 }
0x13c6   :  { %3403 = vmatprep.subr.mxu0 %v3783_v0  ;;  %vm2752_vm10 = vcmp.eq.s32.totalorder %v4070_v11, %v2751_v24  ;;  %v2769_v11 = vld [vmem:[#allocation17 + $0x8] sm:$0xff]  ;;  %vm2927_vm11 = vcmp.eq.s32.totalorder %v4081_v22, %v2751_v24 }
0x13c7   :  { %v2849_v22 = vld [vmem:[%s4543_s22] sm:$0xff] }
0x13c8   :  { %3401 = vmatmul.mubr.msk.f32.vlgmr.msra.gmra.mxu0 %vm224_vm1, %v4128_v41  ;;  %v2349_v41 = vld [vmem:[#allocation11 + $0x8] sm:$0xff] }
0x13c9   :  { %3405 = vmatprep.mubr.msk.f32.mxu0 %vm3784_vm0, %v3783_v0 }
0x147c   :  { %v2229_v25 = vpop.f32.mrf.mxu0 }
0x147d   :  { %3374 = vmatmul.mubr.msk.f32.vlgmr.msra.gmra.mxu1 %vm326_vm2, %v2229_v25  ;;  %v3080_v25 = vsel %vm2752_vm10, 1.0, %v3783_v0 }
0x147e   :  { %v3364_v26 = vpop.f32.mrf.mxu0  ;;  %3395 = vmatprep.mubr.msk.f32.mxu1 %vm3784_vm0, %v3783_v0  ;;  %3388 = vmatpush3.msra.mxu1 %v2351_v31  ;;  %v2768_v31 = vld [vmem:[#allocation17] sm:$0xff] }
0x147f   :  { %3389 = vmatprep.subr.mxu1 %v3783_v0 }
0x1480   :  { %3390 = vmatpush3.msra.mxu1 %v2350_v32  ;;  %v2852_v32 = vld [vmem:[%s4543_s22 + $0x18] sm:$0xff] }
0x1481   :  { %3391 = vmatprep.subr.mxu1 %v3783_v0 }
0x1482   :  { %3392 = vmatpush3.msra.mxu1 %v2349_v41 }
0x1483   :  { %3393 = vmatprep.subr.mxu1 %v3783_v0 }
0x1484   :  { %v2422_v60 = vpop.f32.mrf.mxu0  ;;  %3394 = vmatpush3.msra.mxu1 %v2348_v33 }
0x1485   :  { %3408 = vmatprep.subr.mxu1 %v3783_v0 }
0x1486   :  { %v3386_v28 = vpop.f32.mrf.mxu0 }
0x1488   :  { %v2566_v29 = vpop.f32.mrf.mxu0 }
0x148a   :  { %v3402_v30 = vpop.f32.mrf.mxu0 }
0x148b   :  { %v2770_v30 = vld [vmem:[#allocation17 + $0x10] sm:$0xff] }
0x153d   :  { %v2302_v34 = vpop.f32.mrf.mxu1 }
0x153e   :  { %v2306_v35 = vadd.f32 %v2302_v34, %v2063_v10 }
0x153f   :  { %v3375_v36 = vpop.f32.mrf.mxu1 }
0x1540   :  { %v2307_v37 = vsel %vm326_vm2, %v2306_v35, 0.0 }
0x1541   :  { %v2308_v38 = vrot.slane %v2307_v37, 4 }
0x1543   :  { %v2309_v39 = vadd.f32 %v2308_v38, %v2307_v37 }
0x1545   :  { %v2310_v40 = vrot.slane %v2309_v39, 2 }
0x1547   :  { %v2311_v43 = vadd.f32 %v2310_v40, %v2309_v39 }
0x1549   :  { %v2312_v44 = vrot.slane %v2311_v43, 1 }
0x154b   :  { %v2313_v45 = vadd.f32 %v2312_v44, %v2311_v43 }
0x154d   :  { %v2315_v46 = vmul.f32 0.125, %v2313_v45 }
0x154f   :  { %v2316_v47 = vsub.f32 %v2306_v35, %v2315_v46 }
0x1551   :  { %v2317_v5 = vmul.f32 %v2316_v47, %v2316_v47 }
0x1553   :  { %v2318_v6 = vsel %vm326_vm2, %v2317_v5, 0.0  ;;  %v2930_v5 = vld [vmem:[%s4566_s4] sm:$0xff] }
0x1554   :  { %v2319_v48 = vrot.slane %v2318_v6, 4 }
0x1556   :  { %v2320_v49 = vadd.f32 %v2319_v48, %v2318_v6  ;;  %v3083_v6 = vsel %vm2927_vm11, 1.0, %v3783_v0  ;;  %v2850_v48 = vld [vmem:[%s4543_s22 + $0x8] sm:$0xff] }
0x1558   :  { %v2321_v50 = vrot.slane %v2320_v49, 2 }
0x155a   :  { %v2322_v7 = vadd.f32 %v2321_v50, %v2320_v49  ;;  %v2772_v49 = vld [vmem:[#allocation18] sm:$0x1] }
0x155c   :  { %v2323_v51 = vrot.slane %v2322_v7, 1 }
0x155e   :  { %v2324_v8 = vadd.f32 %v2323_v51, %v2322_v7 }
0x1560   :  { %v2325_v52 = vmul.f32 0.125, %v2324_v8 }
0x1562   :  { %v2326_v53 = vadd.f32 1e-05, %v2325_v52 }
0x1564   :  { %3510 = vrsqrt.f32 %v2326_v53 }
0x1571   :  { %v3511_v54 = vpop.eup %3510 }
0x1572   :  { %v2328_v56 = vmul.f32 %v3511_v54, %v2316_v47  ;;  %v2851_v47 = vld [vmem:[%s4543_s22 + $0x10] sm:$0xff]  ;;  %s3736_s22 = scalar_lea.vmem %s3016_s5, 16 }
0x1573   :  { %p3737_p13 = scmp.ne.s32.totalorder %s3016_s5, %s3736_s22  ;;  %p3742_p1 = scmp.lt.s32.totalorder %s3740_s28, %s3736_s22 }
0x1574   :  { %v2336_v58 = vmul.f32 %v3071_v55, %v2328_v56  ;;  %v2853_v56 = vld [vmem:[#allocation20] sm:$0x1] }
0x1575   :  { %p3743_p2 = por %p3742_p1, %p3741_p0 }
0x1576   :  { %v2344_v9 = vadd.f32 %v3072_v57, %v2336_v58 }
0x1577   :  { %p3744_p3 = pnand %p3743_p2, %p3737_p13 }
0x1578   :  { %vm2345_vm9 = vcmp.ge.f32.partialorder %v2344_v9, 0.0  ;;  %v2346_v15 = vmul.f32 0.01, %v2344_v9 }
0x157a   :  { %v2347_v16 = vsel %vm2345_vm9, %v2344_v9, %v2346_v15 }
0x157b   :  { %3396 = vmatmul.mubr.msk.f32.vlgmr.msra.gmra.mxu1 %vm326_vm2, %v2347_v16 }
0x157c   :  { %3410 = vmatprep.mubr.msk.f32.mxu1 %vm3784_vm0, %v3783_v0 }
0x163b   :  { %v2495_v59 = vpop.f32.mrf.mxu1 }
0x163c   :  { %v2496_v61 = vadd.f32 %v2495_v59, %v2422_v60 }
0x163d   :  { %v3397_v1 = vpop.f32.mrf.mxu1 }
0x163e   :  { %v2570_v2 = vadd.f32 %v2566_v29, %v2496_v61 }
0x1640   :  { %v2578_v62 = vadd.f32 %v3076_v17, %v2570_v2 }
0x1642   :  { %2580 = vrot.lane.b32.xlu1 %v2578_v62, %s3788_s12 }
0x16b4   :  { %v2581_v3 = vpop.permute.xlu1 %2580 }
0x16b5   :  { %3404 = vmatpush3.xpose.msk.msra.mxu0 %vm326_vm2, %v2581_v3 }
0x16b6   :  { %3413 = vmatprep.subr.mxu0 %v3783_v0 }
0x16b8   :  { %3406 = vmatmul.mubr.msk.f32.vlgmr.msra.gmra.mxu0 %vm326_vm2, %v2578_v62 }
0x16b9   :  { %3421 = vmatprep.mubr.msk.f32.mxu0 %vm3784_vm0, %v3783_v0 }
0x1778   :  { %v2652_v4 = vpop.f32.mrf.mxu0 }
0x1779   :  { %v2656_v63 = vmul.f32 0.17677669, %v2652_v4 }
0x177a   :  { %v3407_v10 = vpop.f32.mrf.mxu0 }
0x177b   :  { %v2657_v12 = vsel %vm1415_vm8, %v2656_v63, -1e+30 }
0x177c   :  { %v2658_v13 = vsel %vm224_vm1, %v2657_v12, -inf }
0x177d   :  { %2659 = vmax.xlane.f32.xlu0 %v2658_v13 }
0x1793   :  { %2671 = vrot.lane.b32.xlu0 %v2578_v62, %s3785_s6 }
0x1797   :  { %2674 = vrot.lane.b32.xlu0 %v2578_v62, %s3786_s15 }
0x1806   :  { %v2660_v14 = vpop.xlane.xlu0 %2659 }
0x1807   :  { %v2661_v27 = vsub.f32 %v2657_v12, %v2660_v14 }
0x1809   :  { %v2662_v18 = vmul.f32 1.442695, %v2661_v27 }
0x180a   :  { %v2672_v19 = vpop.permute.xlu0 %2671 }
0x180b   :  { %3512 = vpow2.f32 %v2662_v18  ;;  %3409 = vmatpush3.msra.mxu1 %v2672_v19 }
0x180c   :  { %3424 = vmatprep.subr.mxu1 %v3783_v0 }
0x180e   :  { %v2675_v41 = vpop.permute.xlu0 %2674 }
0x1818   :  { %v3513_v20 = vpop.eup %3512 }
0x1819   :  { %v2664_v21 = vmul.f32 %v3513_v20, %v4325_v42  ;;  %v2771_v42 = vld [vmem:[#allocation17 + $0x18] sm:$0xff] }
0x181a   :  { %3414 = vmatpush3.msra.mxu0 %v2771_v42 }
0x181b   :  { %v2665_v23 = vsel %vm224_vm1, %v2664_v21, 0.0  ;;  %3415 = vmatprep.subr.mxu0 %v3783_v0 }
0x181c   :  { %2666 = vadd.xlane.f32.xlu1 %v2665_v23  ;;  %3416 = vmatpush3.msra.mxu0 %v2770_v30 }
0x181d   :  { %3417 = vmatprep.subr.mxu0 %v3783_v0 }
0x181e   :  { %3418 = vmatpush3.msra.mxu0 %v2769_v11 }
0x181f   :  { %3419 = vmatprep.subr.mxu0 %v3783_v0 }
0x1820   :  { %3420 = vmatpush3.msra.mxu0 %v2768_v31 }
0x1821   :  { %3435 = vmatprep.subr.mxu0 %v3783_v0 }
0x182d   :  { %2757 = vperm.xlu1 %3461, %v3080_v25  }
0x18a5   :  { %v2667_v26 = vpop.xlane.xlu1 %2666 }
0x18a6   :  { %v2668_v60 = vmax.f32 %v2667_v26, 1e-30 }
0x18a8   :  { %3514 = vrcp.f32 %v2668_v60 }
0x18a9   :  { %v2758_v34 = vpop.permute.xlu1 %2757 }
0x18b5   :  { %v3515_v28 = vpop.eup %3514 }
0x18b6   :  { %v2670_v29 = vmul.f32 %v3515_v28, %v2664_v21 }
0x18b8   :  { %3411 = vmatmul.mubr.msk.f32.vlgmr.msra.gmra.mxu1 %vm224_vm1, %v2670_v29 }
0x18b9   :  { %3432 = vmatprep.mubr.msk.f32.mxu1 %vm3784_vm0, %v3783_v0  ;;  %3425 = vmatpush3.msra.mxu1 %v2852_v32 }
0x18ba   :  { %3426 = vmatprep.subr.mxu1 %v3783_v0 }
0x18bb   :  { %3427 = vmatpush3.msra.mxu1 %v2851_v47 }
0x18bc   :  { %3428 = vmatprep.subr.mxu1 %v3783_v0 }
0x18bd   :  { %3429 = vmatpush3.msra.mxu1 %v2850_v48 }
0x18be   :  { %3430 = vmatprep.subr.mxu1 %v3783_v0 }
0x18bf   :  { %3431 = vmatpush3.msra.mxu1 %v2849_v22 }
0x1978   :  { %v2746_v33 = vpop.f32.mrf.mxu1 }
0x1979   :  { %v2747_v35 = vadd.f32 %v2746_v33, %v2675_v41 }
0x197a   :  { %v3412_v36 = vpop.f32.mrf.mxu1 }
0x197b   :  { %v2760_v37 = vmul.f32 %v2758_v34, %v2747_v35 }
0x197d   :  { %v2761_v38 = vsel %vm326_vm2, %v2760_v37, 0.0 }
0x197e   :  { %v2762_v39 = vrot.slane %v2761_v38, 4 }
0x1980   :  { %v2763_v40 = vadd.f32 %v2762_v39, %v2761_v38 }
0x1982   :  { %v2764_v43 = vrot.slane %v2763_v40, 2 }
0x1984   :  { %v2765_v44 = vadd.f32 %v2764_v43, %v2763_v40 }
0x1986   :  { %v2766_v45 = vrot.slane %v2765_v44, 1 }
0x1988   :  { %v2767_v46 = vadd.f32 %v2766_v45, %v2765_v44 }
0x198a   :  { %3422 = vmatmul.mubr.msk.f32.vlgmr.msra.gmra.mxu0 %vm326_vm2, %v2767_v46 }
0x198b   :  { %3437 = vmatprep.mubr.msk.f32.mxu0 %vm3784_vm0, %v3783_v0  ;;  %3436 = vmatpush3.msra.mxu0 %v2930_v5 }
0x198e   :  { %3438 = vmatmul.mubr.msk.f32.vlgmr.msra.gmra.mxu0 %vm224_vm1, %v3083_v6 }
0x1a4a   :  { %v2842_v50 = vpop.f32.mrf.mxu0 }
0x1a4b   :  { %v2843_v7 = vadd.f32 %v2842_v50, %v2772_v49 }
0x1a4c   :  { %v3423_v51 = vpop.f32.mrf.mxu0 }
0x1a4d   :  { %vm2846_vm12 = vcmp.ge.f32.partialorder %v2843_v7, 0.0  ;;  %v2847_v8 = vmul.f32 0.01, %v2843_v7 }
0x1a4e   :  { %v3000_v53 = vpop.f32.mrf.mxu0 }
0x1a4f   :  { %v2848_v52 = vsel %vm2846_vm12, %v2843_v7, %v2847_v8  ;;  %v3004_v55 = vsub.f32 1.0, %v3000_v53 }
0x1a50   :  { %3433 = vmatmul.mubr.msk.f32.vlgmr.msra.gmra.mxu1 %vm326_vm2, %v2848_v52  ;;  %v3439_v54 = vpop.f32.mrf.mxu0 }
0x1a51   :  { %v3005_v57 = vmul.f32 -1e+09, %v3004_v55 }
0x1b10   :  { %v2923_v0 = vpop.f32.mrf.mxu1 }
0x1b11   :  { %v2924_v58 = vadd.f32 %v2923_v0, %v2853_v56 }
0x1b12   :  { %v3434_v9 = vpop.f32.mrf.mxu1 }
0x1b13   :  { %v3006_v15 = vadd.f32 %v3005_v57, %v2924_v58 }
0x1b15   :  { %3008 = vst.msk [vmem:[#allocation21] sm:$0x1] %vm3007_vm13, %v3006_v15 }
0x1b16   :  { %3747 = shalt.err (!%p3744_p3)
}
0x1b17   :  { %3018 = dma.vmem_to_hbm [thread:$0]  %s3016_s5, 16, %s4545_s24, [#allocation5]  }
0x1b18   :  { %3768 = dma.done.wait [#allocation5], 16  }
0x1b19   :  { %3769 = vsyncadd [#allocation5], 4294967280 }
0x1b1a   :  { %3022 = vsyncpa [#allocation4], 1 }
0x1b1b   :  { %3023 = vsyncpa [#allocation7], 1 }
0x1b1c   :  { %3024 = vsyncpa [#allocation10], 1 }
0x1b1d   :  { %3025 = vsyncpa [#allocation13], 1 }
0x1b1e   :  { %3026 = vsyncpa [#allocation16], 1 }
0x1b1f   :  { %3027 = vsyncpa [#allocation19], 1 }
0x1b20   :  { %3028 = vsyncpa [#allocation5], 1 }

</bundles_post_ra>
